<compile_context>
chip_gen: v7x
topology: tpu7x:2x2x1
jax: 0.10.0
libtpu: 0.0.40
codegen_flags: <defaults>
</compile_context>

<pallas_src>
import math
from functools import partial

import jax
import jax.numpy as jnp
from jax.experimental import pallas as pl
from jax.experimental.pallas import tpu as pltpu


PATCH = (8, 8)  # module's self.patch_zie


# ----------------------------- host-side constants -----------------------------
def create_dct_basis(N):
    """Exact JAX port of DCTInit.create_dct_basis (NxN)."""
    n = jnp.arange(N, dtype=jnp.float32).reshape(1, N)
    theta = jnp.pi * (2.0 * n + 1.0) * n.T / (2.0 * N)
    basis = jnp.cos(theta)
    basis = basis.at[0, :].multiply(1.0 / math.sqrt(N))
    basis = basis.at[1:, :].multiply(math.sqrt(2.0 / N))
    return basis


def dct_v_basis(rank):
    """Fixed right factor v: shape (p*q, K*L) with v[(p q),(k l)] = ch[p,k]*cw[q,l]."""
    p, q = PATCH
    K = max(1, int(math.sqrt(rank)))
    L = max(1, int(math.sqrt(rank)))
    ch = create_dct_basis(p)[:, :K]            # (p, K)
    cw = create_dct_basis(q)[:, :L]            # (q, L)
    v = jnp.einsum('pk,ql->pqkl', ch, cw)      # (p, q, K, L)
    return v.reshape(p * q, K * L)             # (64, K*L)


# ----------------------------------- kernel -----------------------------------
def _dct_init_kernel(x_ref, vb_ref, u_ref, s_ref, ssq_ref, *, tile_rows, g, R, eps):
    # x_ref  : (TMp, 64*g)     packed row tile of one batch element (g patches per row)
    # vb_ref : (64*g, g*R)     block-diagonal DCT basis
    # u_ref  : (Mp_pad, g*R)   resident packed-u block (same block across the tile axis)
    # s_ref  : (1, g*R)        per-batch sqrt(s), replicated over the g groups
    # ssq_ref: (1, g*R)        VMEM scratch: running per-packed-column sum of squares
    t = pl.program_id(1)
    n_t = pl.num_programs(1)
    gR = g * R

    @pl.when(t == 0)
    def _init():
        ssq_ref[...] = jnp.zeros_like(ssq_ref)

    # One lane-dense MXU matmul per tile: (TMp, 64g) @ (64g, gR) -> (TMp, gR)
    u0 = jnp.dot(x_ref[...], vb_ref[...], preferred_element_type=jnp.float32)

    row0 = pl.multiple_of(t * tile_rows, tile_rows)
    u_ref[pl.ds(row0, tile_rows), :] = u0                       # stage unscaled DCT coeffs

    # Incremental column sum-of-squares (hidden under the pipelined x DMA).
    ssq_ref[...] += jnp.sum(u0 * u0, axis=0, keepdims=True)     # (1, gR)

    @pl.when(t == n_t - 1)
    def _finalize():
        ssq_p = ssq_ref[...]                                    # (1, gR)
        # Fold the g column groups: packed column c corresponds to original column c % R.
        # fold[c', c] = 1 iff c' % R == c % R, so ssq_p @ fold gives the total per original
        # column, already replicated across the g groups (no tile/reshape needed).
        rmod = jax.lax.broadcasted_iota(jnp.int32, (gR, gR), 0) % R
        cmod = jax.lax.broadcasted_iota(jnp.int32, (gR, gR), 1) % R
        fold = (rmod == cmod).astype(jnp.float32)               # (gR, gR)
        ssq = jnp.dot(ssq_p, fold, preferred_element_type=jnp.float32)   # (1, gR)
        s = jnp.sqrt(ssq)                                       # column L2 norm
        sqrt_s = jnp.sqrt(s)
        scale = sqrt_s / (s + eps)        # fold (u/(s+eps)) * sqrt(s) into one multiply
        u_ref[...] = u_ref[...] * scale
        s_ref[...] = sqrt_s


# ---------------------------------- wrapper -----------------------------------
def dct_init(x, rank, *, eps=1e-8, block_bytes=2 * 1024 * 1024):
    """Pallas equivalent of DCTInit(rank).forward for x of shape (B, n_patches, p*q).

    Returns u: (B, n_patches, K*L) and v: (B, p*q, K*L), K = L = max(1, int(sqrt(rank))).
    (The PyTorch module only runs with a single leading size-1 batch / c == 1;
    this generalizes batch-wise, matching it exactly for B == 1.)
    """
    x = jnp.asarray(x)
    B, M, D = x.shape
    p, q = PATCH
    assert D == p * q, "last dim must be a flattened 8x8 patch (c == 1)"

    # Keep x in its native (MXU-consumable) dtype; only cast if it is something exotic.
    if x.dtype not in (jnp.float32, jnp.bfloat16, jnp.float16):
        x = x.astype(jnp.float32)
    itemsize = jnp.dtype(x.dtype).itemsize

    vb = dct_v_basis(rank)                     # (64, R) f32
    R = vb.shape[-1]

    # Lane packing: g patches per MXU row so loads/stores are full 128-lane width.
    g = max(1, 128 // R)
    Dp = D * g                                 # packed contraction dim
    gR = g * R                                 # packed output width (128 when R | 128)

    # Block-diagonal basis (zeros off-diagonal); cast to x's dtype for direct MXU use.
    vblk = (jnp.einsum('ij,dr->idjr', jnp.eye(g, dtype=jnp.float32), vb)
            .reshape(Dp, gR).astype(x.dtype))

    # Packed row-tile sized so each streamed x block is ~block_bytes (>= 1-2 MiB).
    Mp = pl.cdiv(M, g)
    tm_p = max(8, block_bytes // (Dp * itemsize))
    tm_p = min(tm_p, pl.cdiv(Mp, 8) * 8)
    tm_p = max(8, (tm_p // 8) * 8)
    n_tiles = pl.cdiv(Mp, tm_p)
    Mp_pad = n_tiles * tm_p
    M_pad = Mp_pad * g

    # Zero-pad awkward M (zero rows contribute nothing to the norm; sliced off below).
    if M_pad != M:
        x = jnp.pad(x, ((0, 0), (0, M_pad - M), (0, 0)))
    x_packed = x.reshape(B, Mp_pad, Dp)        # contiguous reshape: free, no copy

    kernel = partial(_dct_init_kernel, tile_rows=tm_p, g=g, R=R, eps=eps)

    flops = 2 * B * Mp_pad * Dp * gR
    bytes_accessed = (B * Mp_pad * Dp * itemsize        # x read
                      + B * Mp_pad * gR * 4             # u write
                      + Dp * gR * itemsize              # basis
                      + B * gR * 4)                     # sqrt_s

    vmem_bytes = (2 * tm_p * Dp * itemsize              # x double buffer
                  + 2 * Dp * gR * itemsize              # basis
                  + 2 * Mp_pad * gR * 4                 # resident packed u (+ writeback)
                  + 2 * 8 * gR * 4                      # sqrt_s output
                  + 8 * gR * 4)                         # ssq scratch (padded)
    vmem_limit = int(min(100 << 20, max(32 << 20, vmem_bytes + (4 << 20))))

    u_packed, s_out = pl.pallas_call(
        kernel,
        out_shape=(jax.ShapeDtypeStruct((B, Mp_pad, gR), jnp.float32),
                   jax.ShapeDtypeStruct((B, 1, gR), jnp.float32)),
        grid_spec=pltpu.PrefetchScalarGridSpec(
            num_scalar_prefetch=0,
            grid=(B, n_tiles),
            in_specs=[
                pl.BlockSpec((None, tm_p, Dp), lambda b, t: (b, t, 0)),   # streamed x tile
                pl.BlockSpec((Dp, gR), lambda b, t: (0, 0)),              # fixed DCT basis
            ],
            out_specs=[
                pl.BlockSpec((None, Mp_pad, gR), lambda b, t: (b, 0, 0)),  # resident packed u
                pl.BlockSpec((None, 1, gR), lambda b, t: (b, 0, 0)),       # sqrt(s) per batch
            ],
            scratch_shapes=[pltpu.VMEM((1, gR), jnp.float32)],
        ),
        compiler_params=pltpu.CompilerParams(
            dimension_semantics=("parallel", "arbitrary"),
            vmem_limit_bytes=vmem_limit,
        ),
        cost_estimate=pl.CostEstimate(
            flops=flops, transcendentals=0, bytes_accessed=bytes_accessed),
    )(x_packed, vblk)

    # Packed (Mp_pad, gR) row-major is byte-identical to (M_pad, R) row-major.
    u = u_packed.reshape(B, M_pad, R)[:, :M, :]
    sqrt_s = s_out[:, :, :R]                            # (B, 1, R)
    v = vb[None, :, :] * sqrt_s                         # (B, 64, R): tiny broadcast in XLA
    return u, v


# ----------------------- pure-JAX reference (mirrors PyTorch) -----------------------
def dct_init_ref(x, rank, *, eps=1e-8):
    B, M, D = x.shape
    p, q = PATCH
    K = max(1, int(math.sqrt(rank)))
    L = max(1, int(math.sqrt(rank)))
    ch = create_dct_basis(p)
    cw = create_dct_basis(q)
    y = x.astype(jnp.float32).reshape(B, M, 1, p, q)
    u = jnp.einsum('bncpq,pk,ql->bnckl', y, ch, cw,
                   precision=jax.lax.Precision.HIGHEST)
    u = u[..., :K, :L].reshape(B, M, K * L)
    v = jnp.einsum('pk,ql->pqkl', ch[:, :K], cw[:, :L]).reshape(p * q, K * L)
    s = jnp.linalg.norm(u, axis=-2, keepdims=True)     # (B, 1, R)
    u = u / (s + eps)
    s = jnp.sqrt(s)
    u = u * s
    v = v[None, :, :] * s                              # (B, D, R)
    return u, v


if __name__ == "__main__":
    B, n_patches, rank = 2, 1024, 4                    # 1024 8x8 grayscale patches per item
    p, q = PATCH
    key = jax.random.PRNGKey(0)
    x = jax.random.normal(key, (B, n_patches, p * q), dtype=jnp.float32)

    u, v = dct_init(x, rank)
    jax.block_until_ready((u, v))

    u_ref, v_ref = dct_init_ref(x, rank)
    K = max(1, int(math.sqrt(rank)))
    assert u.shape == (B, n_patches, K * K)
    assert v.shape == (B, p * q, K * K)
    assert jnp.allclose(u, u_ref, rtol=5e-3, atol=5e-3), float(jnp.max(jnp.abs(u - u_ref)))
    assert jnp.allclose(v, v_ref, rtol=5e-3, atol=5e-3), float(jnp.max(jnp.abs(v - v_ref)))

    print("KERNEL_OK")
</pallas_src>

<mosaic_0001>
module attributes {stable_mosaic.version = 11 : i64} {
  func.func @_dct_init_kernel(%arg0: i32, %arg1: i32, %arg2: memref<1x32x2048xf32, #tpu.memory_space<vmem>>, %arg3: memref<2048x128xf32, #tpu.memory_space<vmem>>, %arg4: memref<1x32x128xf32, #tpu.memory_space<vmem>>, %arg5: memref<1x1x128xf32, #tpu.memory_space<vmem>>, %arg6: memref<1x128xf32, #tpu.memory_space<vmem>>) attributes {dimension_semantics = [#tpu.dimension_semantics<parallel>, #tpu.dimension_semantics<arbitrary>], iteration_bounds = array<i64: 2, 1>, scalar_prefetch = 0 : i64, scratch_operands = 1 : i64, tpu.core_type = #tpu.core_type<tc>, window_params = [{transform_indices = @transform_0, window_bounds = array<i64: 1, 32, 2048>}, {pipeline_mode = #tpu.pipeline_mode<synchronous>, transform_indices = @transform_1, window_bounds = array<i64: 2048, 128>}, {transform_indices = @transform_2, window_bounds = array<i64: 1, 32, 128>}, {transform_indices = @transform_3, window_bounds = array<i64: 1, 1, 128>}]} {
    %c0_i32 = arith.constant 0 : i32
    %0 = arith.cmpi eq, %arg1, %c0_i32 : i32
    %1 = arith.extui %0 : i1 to i32
    %c0_i32_0 = arith.constant 0 : i32
    %2 = arith.cmpi ne, %1, %c0_i32_0 : i32
    scf.if %2 {
      %cst_14 = arith.constant 0.000000e+00 : f32
      %22 = vector.broadcast %cst_14 : f32 to vector<1x128xf32>
      %c0_15 = arith.constant 0 : index
      %c0_16 = arith.constant 0 : index
      %23 = vector.load %arg6[%c0_15, %c0_16] : memref<1x128xf32, #tpu.memory_space<vmem>>, vector<1x128xf32>
      tpu.vector_store %arg6[%c0_15, %c0_16], %22 {strides = array<i32>} : memref<1x128xf32, #tpu.memory_space<vmem>>, vector<1x128xf32>,
    } else {
    }
    %c0 = arith.constant 0 : index
    %c0_1 = arith.constant 0 : index
    %c0_2 = arith.constant 0 : index
    %3 = vector.load %arg2[%c0, %c0_1, %c0_2] : memref<1x32x2048xf32, #tpu.memory_space<vmem>>, vector<1x32x2048xf32>
    %4 = vector.shape_cast %3 : vector<1x32x2048xf32> to vector<32x2048xf32>
    %c0_3 = arith.constant 0 : index
    %c0_4 = arith.constant 0 : index
    %5 = vector.load %arg3[%c0_3, %c0_4] : memref<2048x128xf32, #tpu.memory_space<vmem>>, vector<2048x128xf32>
    %cst = arith.constant dense<0.000000e+00> : vector<32x128xf32>
    %6 = tpu.matmul %4, %5, %cst {dimension_numbers = #tpu.dot_dimension_numbers<[1], [0], [0], [1], [0, 0, 1, 1], [], []>} : vector<32x2048xf32>, vector<2048x128xf32>, vector<32x128xf32> -> vector<32x128xf32>
    %c32_i32 = arith.constant 32 : i32
    %7 = arith.muli %arg1, %c32_i32 : i32
    %8 = tpu.assume_multiple %7, 32 : i32
    %c0_5 = arith.constant 0 : index
    %9 = arith.index_cast %8 : i32 to index
    %c0_6 = arith.constant 0 : index
    %10 = vector.load %arg4[%c0_5, %9, %c0_6] : memref<1x32x128xf32, #tpu.memory_space<vmem>>, vector<1x32x128xf32>
    %11 = vector.shape_cast %10 : vector<1x32x128xf32> to vector<32x128xf32>
    %12 = vector.shape_cast %6 : vector<32x128xf32> to vector<1x32x128xf32>
    tpu.vector_store %arg4[%c0_5, %9, %c0_6], %12 {strides = array<i32>} : memref<1x32x128xf32, #tpu.memory_space<vmem>>, vector<1x32x128xf32>,
    %c0_7 = arith.constant 0 : index
    %c0_8 = arith.constant 0 : index
    %13 = vector.load %arg6[%c0_7, %c0_8] : memref<1x128xf32, #tpu.memory_space<vmem>>, vector<1x128xf32>
    %14 = arith.mulf %6, %6 : vector<32x128xf32>
    %cst_9 = arith.constant dense<0.000000e+00> : vector<128xf32>
    %15 = vector.multi_reduction <add>, %14, %cst_9 [0] : vector<32x128xf32> to vector<128xf32>
    %16 = vector.shape_cast %15 : vector<128xf32> to vector<1x128xf32>
    %17 = arith.addf %13, %16 : vector<1x128xf32>
    %c0_10 = arith.constant 0 : index
    %c0_11 = arith.constant 0 : index
    %18 = vector.load %arg6[%c0_10, %c0_11] : memref<1x128xf32, #tpu.memory_space<vmem>>, vector<1x128xf32>
    tpu.vector_store %arg6[%c0_10, %c0_11], %17 {strides = array<i32>} : memref<1x128xf32, #tpu.memory_space<vmem>>, vector<1x128xf32>,
    %c0_i32_12 = arith.constant 0 : i32
    %19 = arith.cmpi eq, %arg1, %c0_i32_12 : i32
    %20 = arith.extui %19 : i1 to i32
    %c0_i32_13 = arith.constant 0 : i32
    %21 = arith.cmpi ne, %20, %c0_i32_13 : i32
    scf.if %21 {
      %c0_14 = arith.constant 0 : index
      %c0_15 = arith.constant 0 : index
      %22 = vector.load %arg6[%c0_14, %c0_15] : memref<1x128xf32, #tpu.memory_space<vmem>>, vector<1x128xf32>
      %23 = tpu.iota {dimensions = array<i32: 0>} : vector<128x128xi32>
      %c4_i32 = arith.constant 4 : i32
      %c0_i32_16 = arith.constant 0 : i32
      %24 = arith.cmpi eq, %c4_i32, %c0_i32_16 : i32
      %c1_i32 = arith.constant 1 : i32
      %25 = arith.select %24, %c1_i32, %c4_i32 : i32
      %26 = vector.broadcast %25 : i32 to vector<128x128xi32>
      %27 = arith.remsi %23, %26 : vector<128x128xi32>
      %c0_i32_17 = arith.constant 0 : i32
      %28 = vector.broadcast %c0_i32_17 : i32 to vector<128x128xi32>
      %29 = arith.cmpi ne, %27, %28 : vector<128x128xi32>
      %c0_i32_18 = arith.constant 0 : i32
      %30 = vector.broadcast %c0_i32_18 : i32 to vector<128x128xi32>
      %31 = arith.cmpi slt, %27, %30 : vector<128x128xi32>
      %c0_i32_19 = arith.constant 0 : i32
      %32 = arith.cmpi slt, %25, %c0_i32_19 : i32
      %33 = vector.broadcast %32 : i1 to vector<128x128xi1>
      %34 = vector.broadcast %33 : vector<128x128xi1> to vector<128x128xi1>
      %35 = arith.xori %31, %34 : vector<128x128xi1>
      %36 = arith.andi %35, %29 : vector<128x128xi1>
      %37 = vector.broadcast %25 : i32 to vector<128x128xi32>
      %38 = arith.addi %27, %37 : vector<128x128xi32>
      %39 = arith.select %36, %38, %27 : vector<128x128xi1>, vector<128x128xi32>
      %40 = tpu.iota {dimensions = array<i32: 1>} : vector<128x128xi32>
      %c4_i32_20 = arith.constant 4 : i32
      %c0_i32_21 = arith.constant 0 : i32
      %41 = arith.cmpi eq, %c4_i32_20, %c0_i32_21 : i32
      %c1_i32_22 = arith.constant 1 : i32
      %42 = arith.select %41, %c1_i32_22, %c4_i32_20 : i32
      %43 = vector.broadcast %42 : i32 to vector<128x128xi32>
      %44 = arith.remsi %40, %43 : vector<128x128xi32>
      %c0_i32_23 = arith.constant 0 : i32
      %45 = vector.broadcast %c0_i32_23 : i32 to vector<128x128xi32>
      %46 = arith.cmpi ne, %44, %45 : vector<128x128xi32>
      %c0_i32_24 = arith.constant 0 : i32
      %47 = vector.broadcast %c0_i32_24 : i32 to vector<128x128xi32>
      %48 = arith.cmpi slt, %44, %47 : vector<128x128xi32>
      %c0_i32_25 = arith.constant 0 : i32
      %49 = arith.cmpi slt, %42, %c0_i32_25 : i32
      %50 = vector.broadcast %49 : i1 to vector<128x128xi1>
      %51 = vector.broadcast %50 : vector<128x128xi1> to vector<128x128xi1>
      %52 = arith.xori %48, %51 : vector<128x128xi1>
      %53 = arith.andi %52, %46 : vector<128x128xi1>
      %54 = vector.broadcast %42 : i32 to vector<128x128xi32>
      %55 = arith.addi %44, %54 : vector<128x128xi32>
      %56 = arith.select %53, %55, %44 : vector<128x128xi1>, vector<128x128xi32>
      %57 = arith.cmpi eq, %39, %56 : vector<128x128xi32>
      %58 = arith.extui %57 : vector<128x128xi1> to vector<128x128xi32>
      %59 = arith.sitofp %58 : vector<128x128xi32> to vector<128x128xf32>
      %cst_26 = arith.constant dense<0.000000e+00> : vector<1x128xf32>
      %60 = tpu.matmul %22, %59, %cst_26 {dimension_numbers = #tpu.dot_dimension_numbers<[1], [0], [0], [1], [0, 0, 1, 1], [], []>} : vector<1x128xf32>, vector<128x128xf32>, vector<1x128xf32> -> vector<1x128xf32>
      %61 = math.sqrt %60 : vector<1x128xf32>
      %62 = math.sqrt %61 : vector<1x128xf32>
      %cst_27 = arith.constant 9.99999993E-9 : f32
      %63 = vector.broadcast %cst_27 : f32 to vector<1x128xf32>
      %64 = arith.addf %61, %63 : vector<1x128xf32>
      %65 = arith.divf %62, %64 : vector<1x128xf32>
      %c0_28 = arith.constant 0 : index
      %c0_29 = arith.constant 0 : index
      %c0_30 = arith.constant 0 : index
      %66 = vector.load %arg4[%c0_28, %c0_29, %c0_30] : memref<1x32x128xf32, #tpu.memory_space<vmem>>, vector<1x32x128xf32>
      %67 = vector.shape_cast %66 : vector<1x32x128xf32> to vector<32x128xf32>
      %68 = vector.broadcast %65 : vector<1x128xf32> to vector<32x128xf32>
      %69 = arith.mulf %67, %68 : vector<32x128xf32>
      %c0_31 = arith.constant 0 : index
      %c0_32 = arith.constant 0 : index
      %c0_33 = arith.constant 0 : index
      %70 = vector.load %arg4[%c0_31, %c0_32, %c0_33] : memref<1x32x128xf32, #tpu.memory_space<vmem>>, vector<1x32x128xf32>
      %71 = vector.shape_cast %70 : vector<1x32x128xf32> to vector<32x128xf32>
      %72 = vector.shape_cast %69 : vector<32x128xf32> to vector<1x32x128xf32>
      tpu.vector_store %arg4[%c0_31, %c0_32, %c0_33], %72 {strides = array<i32>} : memref<1x32x128xf32, #tpu.memory_space<vmem>>, vector<1x32x128xf32>,
      %c0_34 = arith.constant 0 : index
      %c0_35 = arith.constant 0 : index
      %c0_36 = arith.constant 0 : index
      %73 = vector.load %arg5[%c0_34, %c0_35, %c0_36] : memref<1x1x128xf32, #tpu.memory_space<vmem>>, vector<1x1x128xf32>
      %74 = vector.shape_cast %73 : vector<1x1x128xf32> to vector<1x128xf32>
      %75 = vector.shape_cast %62 : vector<1x128xf32> to vector<1x1x128xf32>
      tpu.vector_store %arg5[%c0_34, %c0_35, %c0_36], %75 {strides = array<i32>} : memref<1x1x128xf32, #tpu.memory_space<vmem>>, vector<1x1x128xf32>,
    } else {
    }
    return
  }
  func.func @transform_0(%arg0: i32, %arg1: i32) -> (i32, i32, i32) {
    %c0_i32 = arith.constant 0 : i32
    %c0_i32_0 = arith.constant 0 : i32
    return %arg0, %arg1, %c0_i32 : i32, i32, i32
  }
  func.func @transform_1(%arg0: i32, %arg1: i32) -> (i32, i32) {
    %c0_i32 = arith.constant 0 : i32
    %c0_i32_0 = arith.constant 0 : i32
    %c0_i32_1 = arith.constant 0 : i32
    return %c0_i32, %c0_i32_0 : i32, i32
  }
  func.func @transform_2(%arg0: i32, %arg1: i32) -> (i32, i32, i32) {
    %c0_i32 = arith.constant 0 : i32
    %c0_i32_0 = arith.constant 0 : i32
    %c0_i32_1 = arith.constant 0 : i32
    return %arg0, %c0_i32, %c0_i32_0 : i32, i32, i32
  }
  func.func @transform_3(%arg0: i32, %arg1: i32) -> (i32, i32, i32) {
    %c0_i32 = arith.constant 0 : i32
    %c0_i32_0 = arith.constant 0 : i32
    %c0_i32_1 = arith.constant 0 : i32
    return %arg0, %c0_i32, %c0_i32_0 : i32, i32, i32
  }
}

</mosaic_0001>

<bundles_post_ra>
// kernel: tpu_custom_call.1
= control target key start
LH: loop header
LB: loop body
LE: loop exit
PB: predicated region body
PF: predicated region fallthrough
CT: control target
= control target key end

     0   :  { %9 = vsyncpa [#allocation4], 0  ;;  %s3249_s0 = inlined_call_operand.hbm [shape: f32[2,32,2048], index: 0, kind: input, shape index: {}]   ;;  %s3250_s1 = inlined_call_operand.hbm [shape: f32[2048,128], index: 1, kind: input, shape index: {}]   ;;  %s3251_s2 = inlined_call_operand.hbm [shape: f32[2,32,128], index: 2, kind: output, shape index: {0}]   ;;  %s3252_s3 = inlined_call_operand.hbm [shape: f32[2,1,128], index: 3, kind: output, shape index: {1}]  }
   0x1   :  { %11 = vsyncpa [#allocation4 + $0x1], 0 }
   0x2   :  { %12 = vsyncpa [#allocation7], 0 }
   0x3   :  { %13 = vsyncpa [#allocation5], 0 }
   0x4   :  { %15 = vsyncpa [#allocation5 + $0x1], 0 }
   0x5   :  { %16 = vsyncpa [#allocation10], 0 }
   0x6   :  { %18 = vsyncpa [#allocation10 + $0x1], 0  ;;  %s2833_s12 = smov 0   ;;  %s2835_s13 = smov 0  }
   0x7   :  { %s2837_s14 = smov 0   ;;  %s2839_s15 = smov 0  }
   0x8   :  { %s2841_s16 = smov 0   ;;  %s2843_s17 = smov 0  }
   0x9 LB: > { %s1793_s18 = sadd.s32 4294967295, %s2798_s17   ;;  %s1794_s19 = sadd.s32 4294967294, %s2798_s17   ;;  %s2798_s17 = sphi %s2843_s17, %s24_s17   ;;  %s2794_s16 = sphi %s2841_s16, %s3280_s16   ;;  %s2790_s15 = sphi %s2839_s15, %s3279_s15   ;;  %s2786_s14 = sphi %s2837_s14, %s3278_s14   ;;  %s2782_s13 = sphi %s2835_s13, %s3277_s13   ;;  %s2778_s12 = sphi %s2833_s12, %s3276_s12  }
   0xa   : > { %p58_p0 = scmp.ne.s32.totalorder %s2782_s13, %s2778_s12  ;;  %p2867_p1 = scmp.eq.s32.totalorder %s1793_s18, 0 }
   0xb   : > { %p2871_p2 = scmp.eq.s32.totalorder %s1793_s18, 1  ;;  %p109_p3 = scmp.eq.s32.totalorder %s1794_s19, 1 }
   0xc   : > { %s3257_s20 = scalar_select %p2867_p1, 1, 0 }
   0xd   : > { %s3258_s21 = scalar_select %p2871_p2, 1, 0 }
   0xe   : > { %p2877_p4 = por %p2867_p1, %p58_p0  ;;  %p1795_p5 = scmp.ge.s32.totalorder %s2798_s17, 1 }
   0xf   : > { %p2882_p6 = por %p109_p3, %p58_p0  ;;  %p142_p7 = scmp.lt.s32.totalorder %s2798_s17, 3 }
  0x10   : > { %s3259_s22 = scalar_select %p2877_p4, 1, 0 }
  0x11   : > { %s3260_s23 = scalar_select %p2882_p6, 1, 0 }
  0x12   : > { %p2887_p8 = pnand %p1795_p5, %p142_p7  ;;  %s2800_s25 = smov [#allocation6]  }
  0x13   : > { %s154_s26 = sshll.u32 %s2800_s25, 4  ;;  %s36_s28 = sadd.s32 1, %s2794_s16  ;;  %s155_s26 = int_to_ptr.vmem [resolvable:$true] %s154_s26 }
  0x14   : > { %s3261_s24 = scalar_select %p2887_p8, 1, 0 }
  0x15   : > { %p2539_p9 = pneg %p2887_p8  ;;  %s2622_s4 = scalar_lea.hbm %s3250_s1, 32768 }
  0x16   : > { %p2623_p12 = scmp.ne.s32.totalorder %s3250_s1, %s2622_s4  ;;  %p2629_p5 = scmp.lt.u32.totalorder %s2622_s4, %s3250_s1 }
  0x17   : > { %p2896_p11 = pnand %p2539_p9, %p2867_p1 }
  0x19   : > { %p2624_p13 = pneg %p2896_p11 }
  0x1b   : > { %p2625_p0 = pnand %p2624_p13, %p2623_p12 }
  0x1d   : > { %p2626_p3 = pneg %p2625_p0 }
  0x1f   : > { %p2631_p7 = pnand %p2629_p5, %p2626_p3 }
  0x21   : > { %2634 = shalt.err (!%p2631_p7)
}
  0x22   : > { %s2635_s9 = scalar_lea.vmem %s155_s26, 32768  ;;  %p2643_p1 = scmp.lt.s32.totalorder %s155_s26, %s155_s26 }
  0x23   : > { %p2636_p9 = scmp.ne.s32.totalorder %s155_s26, %s2635_s9  ;;  %p2644_p4 = scmp.lt.s32.totalorder %s2635_s9, %s2635_s9 }
  0x25   : > { %p2638_p10 = pnand %p2636_p9, %p2624_p13  ;;  %p2645_p8 = por %p2644_p4, %p2643_p1 }
  0x27   : > { %p2639_p6 = pneg %p2638_p10 }
  0x29   : > { %p2646_p2 = pnand %p2645_p8, %p2639_p6 }
  0x2b   : > { %2649 = shalt.err (!%p2646_p2)
}
  0x2c   : > { %s2801_s10 = smov 128   ;;  %s2802_s11 = smov 8  }
  0x2d   : > { %2542 = dma.hbm_to_vmem [thread:$0]  (!%p2896_p11), %s3250_s1, 32768, %s155_s26, [#allocation7], %s2801_s10, %s2801_s10, %s2802_s11  }
  0x2e   : > { %p38_p1 = scmp.ge.s32.totalorder %s36_s28, 2  ;;  %s45_s25 = sadd.s32 1, %s2786_s14 }
  0x2f   : > { %p52_p2 = scmp.ne.s32.totalorder %s2786_s14, %s2782_s13  ;;  %p53_p4 = scmp.eq.s32.totalorder %s2798_s17, 0 }
  0x30   : > { %s3282_s28 = smov (%p38_p1, %s36_s28), 0  ;;  %p3264_p8 = scmp.ne.s32.totalorder %s3258_s21, 0 }
  0x31   : > { %p2925_p6 = por %p53_p4, %p52_p2  ;;  %s40_s30 = ssub.s32 %s2794_s16, %s3282_s28 }
  0x32   : > { %p2931_p10 = por %p3264_p8, %p52_p2  ;;  %p2555_p12 = scmp.lt.s32.totalorder %s2798_s17, 2 }
  0x33   : > { %p43_p11 = scmp.eq.s32.totalorder %s40_s30, 0  ;;  %s168_s26 = sand.u32 1, %s2786_s14  }
  0x34   : > { %s1798_s4 = sshll.u32 %s168_s26, 9  ;;  %s1843_s6 = sshll.u32 %s2794_s16, 13 }
  0x35   : > { %s2940_s5 = scalar_select %p43_p11, %s2786_s14, %s45_s25  }
  0x36   : > { %s2946_s9 = scalar_lea.hbm %s3249_s0, %s1843_s6  ;;  %s172_s21 = scalar_lea.vmem [#allocation3], %s1798_s4 }
  0x37   : > { %s182_s11 = sshll.u32 %s172_s21, 4  ;;  %p2952_p13 = pnand %p2555_p12, %p2925_p6  ;;  %s2948_s11 = int_to_ptr.vmem [resolvable:$true] %s182_s11 }
  0x38   : > { %s2956_s19 = scalar_lea.sflag [#allocation4], %s168_s26  ;;  %s2650_s25 = scalar_lea.hbm %s2946_s9, 8192 }
  0x39   : > { %p2651_p0 = scmp.ne.s32.totalorder %s2946_s9, %s2650_s25  ;;  %p2652_p3 = pneg %p2952_p13 }
  0x3a   : > { %s2655_s29 = scalar_lea.hbm %s3249_s0, 16384  ;;  %p2656_p9 = scmp.lt.u32.totalorder %s2946_s9, %s3249_s0 }
  0x3b   : > { %p2653_p5 = pnand %p2652_p3, %p2651_p0  ;;  %p2657_p1 = scmp.lt.u32.totalorder %s2655_s29, %s2650_s25 }
  0x3c   : > { %p2659_p4 = scmp.lt.u32.totalorder %s2650_s25, %s2946_s9 }
  0x3d   : > { %p2654_p7 = pneg %p2653_p5  ;;  %p2658_p2 = por %p2657_p1, %p2656_p9 }
  0x3f   : > { %p2660_p6 = por %p2659_p4, %p2658_p2 }
  0x41   : > { %p2661_p8 = pnand %p2660_p6, %p2654_p7 }
  0x43   : > { %2664 = shalt.err (!%p2661_p8)
}
  0x44   : > { %s2665_s26 = scalar_lea.vmem %s2948_s11, 8192  ;;  %s2803_s8 = smov [#allocation3]  }
  0x45   : > { %p2666_p12 = scmp.ne.s32.totalorder %s2948_s11, %s2665_s26  ;;  %s2670_s21 = sshll.u32 %s2803_s8, 4  ;;  %s2671_s21 = int_to_ptr.vmem [resolvable:$false] %s2670_s21 }
  0x46   : > { %s2672_s30 = scalar_lea.vmem %s2671_s21, 16384  ;;  %p2673_p5 = scmp.lt.s32.totalorder %s2948_s11, %s2671_s21 }
  0x47   : > { %p2668_p11 = pnand %p2666_p12, %p2652_p3  ;;  %p2674_p9 = scmp.lt.s32.totalorder %s2672_s30, %s2665_s26 }
  0x49   : > { %p2669_p0 = pneg %p2668_p11  ;;  %p2675_p1 = por %p2674_p9, %p2673_p5 }
  0x4b   : > { %p2676_p2 = pnand %p2675_p1, %p2669_p0 }
  0x4d   : > { %2679 = shalt.err (!%p2676_p2)
}
  0x4e   : > { %s2804_s25 = smov 2048   ;;  %p3267_p3 = scmp.ne.s32.totalorder %s3261_s24, 0 }
  0x4f   : > { %2546 = dma.hbm_to_vmem [thread:$0]  (!%p2952_p13), %s2946_s9, 8192, %s2948_s11, %s2956_s19, %s2804_s25, %s2804_s25, %s2801_s10  }
  0x50   : > { %194 = sbr.rel (%p3267_p3) target bundleno = 760 (0x2f8), region = 28  ;;  %s2988_s4 = sand.u32 (!%p3267_p3), 1, %s2782_s13  }
  0x51   : > { %s1802_s29 = sshll.u32 (!%p3267_p3), %s2988_s4, 9  ;;  %s197_s6 = scalar_lea.sflag (!%p3267_p3), [#allocation4], %s2988_s4 }
  0x52   : > { %s2992_s7 = scalar_lea.vmem (!%p3267_p3), [#allocation3], %s1802_s29  ;;  %p3268_p7 = scmp.ne.s32.totalorder (!%p3267_p3), %s3259_s22, 0 }
  0x57   : > { %2761 = dma.done.wait (%p3268_p7), %s197_s6, 8192  }
  0x58   : > { %2763 = vsyncadd (%p3268_p7), %s197_s6, 4294959104  ;;  %p3269_p13 = scmp.ne.s32.totalorder %s3257_s20, 0 }
  0x5a   : > { %2765 = dma.done.wait (%p3269_p13), [#allocation7], 32768  }
  0x5b   : > { %2767 = vsyncadd (%p3269_p13), [#allocation7], 4294934528  ;;  %v317_v0 = vld [vmem:[#allocation6 + $0x80] sm:$0xff]  ;;  %v318_v1 = vld [vmem:[#allocation6 + $0x88] sm:$0xff]  ;;  %s1804_s20 = sshll.u32 %s2988_s4, 5  ;;  %s1840_s22 = sshll.u32 %s2790_s15, 4 }
  0x5c   : > { %v349_v2 = vld [vmem:[#allocation6 + $0x180] sm:$0xff]  ;;  %v2249_v3 = vpack.c.bf16 %v318_v1, %v317_v0  ;;  %v350_v4 = vld [vmem:[#allocation6 + $0x188] sm:$0xff]  ;;  %v319_v11 = vld [vmem:[#allocation6 + $0x90] sm:$0xff]  ;;  %s230_s24 = scalar_lea.vmem [#allocation9], %s2988_s4  ;;  %s3153_s18 = scalar_lea.hbm %s3252_s3, %s1840_s22 }
  0x5d   : > { %v301_v5 = vld [vmem:[#allocation6] sm:$0xff]  ;;  %v302_v6 = vld [vmem:[#allocation6 + $0x8] sm:$0xff]  ;;  %v2281_v7 = vpack.c.bf16 %v350_v4, %v349_v2  ;;  %v320_v13 = vld [vmem:[#allocation6 + $0x98] sm:$0xff]  ;;  %s1672_s10 = sshll.u32 %s230_s24, 4  ;;  %s1844_s19 = sshll.u32 %s2790_s15, 9  ;;  %s3155_s10 = int_to_ptr.vmem [resolvable:$true] %s1672_s10 }
  0x5e   : > { %v2251_v8 = vpack.c.bf16 %v302_v6, %v301_v5  ;;  %v333_v9 = vld [vmem:[#allocation6 + $0x100] sm:$0xff]  ;;  %v334_v10 = vld [vmem:[#allocation6 + $0x108] sm:$0xff]  ;;  %2250 = vmatprep.subr.bf16.mxu0 %v2249_v3  ;;  %v351_v14 = vld [vmem:[#allocation6 + $0x190] sm:$0xff]  ;;  %v2253_v16 = vpack.c.bf16 %v320_v13, %v319_v11  ;;  %s3158_s26 = scalar_lea.vmem [#allocation8], %s1804_s20  ;;  %s1644_s21 = scalar_lea.sflag [#allocation10], %s2988_s4 }
  0x5f   : > { %v2283_v12 = vpack.c.bf16 %v334_v10, %v333_v9  ;;  %v352_v15 = vld [vmem:[#allocation6 + $0x198] sm:$0xff]  ;;  %2282 = vmatprep.subr.bf16.mxu1 %v2281_v7  ;;  %v303_v18 = vld [vmem:[#allocation6 + $0x10] sm:$0xff]  ;;  %v321_v23 = vld [vmem:[#allocation6 + $0xa0] sm:$0xff]  ;;  %s1656_s8 = sshll.u32 %s3158_s26, 4  ;;  %s2680_s30 = scalar_lea.vmem %s3155_s10, 16  ;;  %s3192_s8 = int_to_ptr.vmem [resolvable:$true] %s1656_s8 }
  0x60   : > { %2252 = vmatpush3.bf16.msra.mxu0 %v2251_v8  ;;  %v2285_v17 = vpack.c.bf16 %v352_v15, %v351_v14  ;;  %v304_v19 = vld [vmem:[#allocation6 + $0x18] sm:$0xff]  ;;  %v335_v20 = vld [vmem:[#allocation6 + $0x110] sm:$0xff]  ;;  %v322_v24 = vld [vmem:[#allocation6 + $0xa8] sm:$0xff]  ;;  %p2681_p4 = scmp.ne.s32.totalorder %s3155_s10, %s2680_s30  ;;  %s2809_s25 = smov [#allocation9]  }
  0x61   : > { %2284 = vmatpush3.bf16.msra.mxu1 %v2283_v12  ;;  %v2255_v21 = vpack.c.bf16 %v304_v19, %v303_v18  ;;  %v336_v22 = vld [vmem:[#allocation6 + $0x118] sm:$0xff]  ;;  %2254 = vmatprep.subr.bf16.mxu0 %v2253_v16  ;;  %v2257_v26 = vpack.c.bf16 %v322_v24, %v321_v23  ;;  %v353_v27 = vld [vmem:[#allocation6 + $0x1a0] sm:$0xff]  ;;  %v354_v28 = vld [vmem:[#allocation6 + $0x1a8] sm:$0xff]  ;;  %s2684_s29 = sshll.u32 %s2809_s25, 4  ;;  %s2685_s29 = int_to_ptr.vmem [resolvable:$false] %s2684_s29 }
  0x62   : > { %2286 = vmatprep.subr.bf16.mxu1 %v2285_v17  ;;  %v2287_v25 = vpack.c.bf16 %v336_v22, %v335_v20  ;;  %v305_v29 = vld [vmem:[#allocation6 + $0x20] sm:$0xff]  ;;  %v2289_v30 = vpack.c.bf16 %v354_v28, %v353_v27  ;;  %v306_v31 = vld [vmem:[#allocation6 + $0x28] sm:$0xff]  ;;  %v323_v35 = vld [vmem:[#allocation6 + $0xb0] sm:$0xff]  ;;  %p2682_p6 = pnand %p2681_p4, %p2931_p10  ;;  %s2686_s6 = scalar_lea.vmem %s2685_s29, 32 }
  0x63   : > { %v337_v32 = vld [vmem:[#allocation6 + $0x120] sm:$0xff]  ;;  %v338_v33 = vld [vmem:[#allocation6 + $0x128] sm:$0xff]  ;;  %v2259_v34 = vpack.c.bf16 %v306_v31, %v305_v29  ;;  %v324_v36 = vld [vmem:[#allocation6 + $0xb8] sm:$0xff]  ;;  %p2687_p12 = scmp.lt.s32.totalorder %s3155_s10, %s2685_s29  ;;  %p2688_p11 = scmp.lt.s32.totalorder %s2686_s6, %s2680_s30 }
  0x64   : > { %2256 = vmatpush3.bf16.msra.mxu0 %v2255_v21  ;;  %v355_v37 = vld [vmem:[#allocation6 + $0x1b0] sm:$0xff]  ;;  %v2291_v38 = vpack.c.bf16 %v338_v33, %v337_v32  ;;  %v2261_v39 = vpack.c.bf16 %v324_v36, %v323_v35  ;;  %v356_v40 = vld [vmem:[#allocation6 + $0x1b8] sm:$0xff]  ;;  %v325_v46 = vld [vmem:[#allocation6 + $0xc0] sm:$0xff]  ;;  %p2683_p8 = pneg %p2682_p6 }
  0x65   : > { %2288 = vmatpush3.bf16.msra.mxu1 %v2287_v25  ;;  %2258 = vmatprep.subr.bf16.mxu0 %v2257_v26  ;;  %v307_v41 = vld [vmem:[#allocation6 + $0x30] sm:$0xff]  ;;  %v308_v42 = vld [vmem:[#allocation6 + $0x38] sm:$0xff]  ;;  %v2293_v43 = vpack.c.bf16 %v356_v40, %v355_v37  ;;  %v326_v47 = vld [vmem:[#allocation6 + $0xc8] sm:$0xff]  ;;  %p2689_p0 = por %p2688_p11, %p2687_p12 }
  0x66   : > { %2290 = vmatprep.subr.bf16.mxu1 %v2289_v30  ;;  %v339_v44 = vld [vmem:[#allocation6 + $0x130] sm:$0xff]  ;;  %v340_v45 = vld [vmem:[#allocation6 + $0x138] sm:$0xff]  ;;  %v357_v48 = vld [vmem:[#allocation6 + $0x1c0] sm:$0xff]  ;;  %v2263_v50 = vpack.c.bf16 %v308_v42, %v307_v41  ;;  %v2265_v52 = vpack.c.bf16 %v326_v47, %v325_v46 }
  0x67   : > { %v358_v49 = vld [vmem:[#allocation6 + $0x1c8] sm:$0xff]  ;;  %v2295_v51 = vpack.c.bf16 %v340_v45, %v339_v44  ;;  %v309_v53 = vld [vmem:[#allocation6 + $0x40] sm:$0xff]  ;;  %v327_v58 = vld [vmem:[#allocation6 + $0xd0] sm:$0xff]  ;;  %p2690_p5 = pnand %p2689_p0, %p2683_p8 }
  0x68   : > { %2260 = vmatpush3.bf16.msra.mxu0 %v2259_v34  ;;  %v310_v54 = vld [vmem:[#allocation6 + $0x48] sm:$0xff]  ;;  %v341_v55 = vld [vmem:[#allocation6 + $0x140] sm:$0xff]  ;;  %v2297_v56 = vpack.c.bf16 %v358_v49, %v357_v48  ;;  %v328_v59 = vld [vmem:[#allocation6 + $0xd8] sm:$0xff] }
  0x69   : > { %2292 = vmatpush3.bf16.msra.mxu1 %v2291_v38  ;;  %2262 = vmatprep.subr.bf16.mxu0 %v2261_v39  ;;  %v342_v57 = vld [vmem:[#allocation6 + $0x148] sm:$0xff]  ;;  %v359_v60 = vld [vmem:[#allocation6 + $0x1d0] sm:$0xff]  ;;  %v360_v61 = vld [vmem:[#allocation6 + $0x1d8] sm:$0xff]  ;;  %v2267_v62 = vpack.c.bf16 %v310_v54, %v309_v53  ;;  %v2269_v0 = vpack.c.bf16 %v328_v59, %v327_v58 }
  0x6a   : > { %2294 = vmatprep.subr.bf16.mxu1 %v2293_v43  ;;  %v2299_v63 = vpack.c.bf16 %v342_v57, %v341_v55  ;;  %v311_v1 = vld [vmem:[#allocation6 + $0x50] sm:$0xff]  ;;  %v312_v2 = vld [vmem:[#allocation6 + $0x58] sm:$0xff]  ;;  %v2301_v4 = vpack.c.bf16 %v360_v61, %v359_v60  ;;  %v329_v6 = vld [vmem:[#allocation6 + $0xe0] sm:$0xff] }
  0x6b   : > { %v343_v3 = vld [vmem:[#allocation6 + $0x150] sm:$0xff]  ;;  %v344_v5 = vld [vmem:[#allocation6 + $0x158] sm:$0xff]  ;;  %v330_v7 = vld [vmem:[#allocation6 + $0xe8] sm:$0xff]  ;;  %v2271_v10 = vpack.c.bf16 %v312_v2, %v311_v1 }
  0x6c   : > { %2264 = vmatpush3.bf16.msra.mxu0 %v2263_v50  ;;  %v361_v8 = vld [vmem:[#allocation6 + $0x1e0] sm:$0xff]  ;;  %v362_v9 = vld [vmem:[#allocation6 + $0x1e8] sm:$0xff]  ;;  %v2303_v13 = vpack.c.bf16 %v344_v5, %v343_v3  ;;  %v2273_v14 = vpack.c.bf16 %v330_v7, %v329_v6  ;;  %v240_v17 = vld [vmem:[%s2992_s7 + $0x18] sm:$0xff] }
  0x6d   : > { %2296 = vmatpush3.bf16.msra.mxu1 %v2295_v51  ;;  %2266 = vmatprep.subr.bf16.mxu0 %v2265_v52  ;;  %v313_v11 = vld [vmem:[#allocation6 + $0x60] sm:$0xff]  ;;  %v314_v12 = vld [vmem:[#allocation6 + $0x68] sm:$0xff]  ;;  %v2305_v18 = vpack.c.bf16 %v362_v9, %v361_v8  ;;  %v331_v20 = vld [vmem:[#allocation6 + $0xf0] sm:$0xff] }
  0x6e   : > { %2298 = vmatprep.subr.bf16.mxu1 %v2297_v56  ;;  %v345_v15 = vld [vmem:[#allocation6 + $0x160] sm:$0xff]  ;;  %v238_v16 = vld [vmem:[%s2992_s7 + $0x8] sm:$0xff]  ;;  %v332_v21 = vld [vmem:[#allocation6 + $0xf8] sm:$0xff]  ;;  %706 = vmatprep.mubr.f32.mxu1 %v240_v17  ;;  %v2275_v24 = vpack.c.bf16 %v314_v12, %v313_v11 }
  0x6f   : > { %v346_v19 = vld [vmem:[#allocation6 + $0x168] sm:$0xff]  ;;  %621 = vmatprep.mubr.f32.mxu0 %v238_v16  ;;  %v363_v22 = vld [vmem:[#allocation6 + $0x1f0] sm:$0xff]  ;;  %v364_v23 = vld [vmem:[#allocation6 + $0x1f8] sm:$0xff]  ;;  %v2277_v26 = vpack.c.bf16 %v332_v21, %v331_v20 }
  0x70   : > { %2268 = vmatpush3.bf16.msra.mxu0 %v2267_v62  ;;  %v2307_v25 = vpack.c.bf16 %v346_v19, %v345_v15  ;;  %v315_v27 = vld [vmem:[#allocation6 + $0x70] sm:$0xff]  ;;  %v316_v28 = vld [vmem:[#allocation6 + $0x78] sm:$0xff]  ;;  %v2309_v30 = vpack.c.bf16 %v364_v23, %v363_v22  ;;  %v381_v32 = vld [vmem:[#allocation6 + $0x280] sm:$0xff] }
  0x71   : > { %2300 = vmatpush3.bf16.msra.mxu1 %v2299_v63  ;;  %2270 = vmatprep.subr.bf16.mxu0 %v2269_v0  ;;  %v347_v29 = vld [vmem:[#allocation6 + $0x170] sm:$0xff]  ;;  %v348_v31 = vld [vmem:[#allocation6 + $0x178] sm:$0xff]  ;;  %v382_v33 = vld [vmem:[#allocation6 + $0x288] sm:$0xff]  ;;  %v2279_v36 = vpack.c.bf16 %v316_v28, %v315_v27 }
  0x72   : > { %2302 = vmatprep.subr.bf16.mxu1 %v2301_v4  ;;  %v413_v34 = vld [vmem:[#allocation6 + $0x380] sm:$0xff]  ;;  %v414_v35 = vld [vmem:[#allocation6 + $0x388] sm:$0xff]  ;;  %v2311_v37 = vpack.c.bf16 %v348_v31, %v347_v29  ;;  %v2313_v38 = vpack.c.bf16 %v382_v33, %v381_v32  ;;  %v383_v44 = vld [vmem:[#allocation6 + $0x290] sm:$0xff] }
  0x73   : > { %v365_v39 = vld [vmem:[#allocation6 + $0x200] sm:$0xff]  ;;  %v366_v40 = vld [vmem:[#allocation6 + $0x208] sm:$0xff]  ;;  %v2345_v42 = vpack.c.bf16 %v414_v35, %v413_v34  ;;  %v384_v45 = vld [vmem:[#allocation6 + $0x298] sm:$0xff] }
  0x74   : > { %2272 = vmatpush3.bf16.msra.mxu0 %v2271_v10  ;;  %v397_v41 = vld [vmem:[#allocation6 + $0x300] sm:$0xff]  ;;  %v398_v43 = vld [vmem:[#allocation6 + $0x308] sm:$0xff]  ;;  %v415_v46 = vld [vmem:[#allocation6 + $0x390] sm:$0xff]  ;;  %v2315_v50 = vpack.c.bf16 %v366_v40, %v365_v39  ;;  %v2317_v52 = vpack.c.bf16 %v384_v45, %v383_v44 }
  0x75   : > { %2304 = vmatpush3.bf16.msra.mxu1 %v2303_v13  ;;  %2274 = vmatprep.subr.bf16.mxu0 %v2273_v14  ;;  %v416_v47 = vld [vmem:[#allocation6 + $0x398] sm:$0xff]  ;;  %v237_v48 = vld [vmem:[%s2992_s7] sm:$0xff]  ;;  %v239_v49 = vld [vmem:[%s2992_s7 + $0x10] sm:$0xff]  ;;  %v2347_v51 = vpack.c.bf16 %v398_v43, %v397_v41 }
  0x76   : > { %2306 = vmatprep.subr.bf16.mxu1 %v2305_v18  ;;  %v367_v53 = vld [vmem:[#allocation6 + $0x210] sm:$0xff]  ;;  %v368_v54 = vld [vmem:[#allocation6 + $0x218] sm:$0xff]  ;;  %v2349_v56 = vpack.c.bf16 %v416_v47, %v415_v46  ;;  %v385_v58 = vld [vmem:[#allocation6 + $0x2a0] sm:$0xff] }
  0x77   : > { %v399_v55 = vld [vmem:[#allocation6 + $0x310] sm:$0xff]  ;;  %v400_v57 = vld [vmem:[#allocation6 + $0x318] sm:$0xff]  ;;  %v386_v59 = vld [vmem:[#allocation6 + $0x2a8] sm:$0xff]  ;;  %v2319_v63 = vpack.c.bf16 %v368_v54, %v367_v53 }
  0x78   : > { %2276 = vmatpush3.bf16.msra.mxu0 %v2275_v24  ;;  %v369_v60 = vld [vmem:[#allocation6 + $0x220] sm:$0xff]  ;;  %v418_v62 = vld [vmem:[#allocation6 + $0x3a8] sm:$0xff]  ;;  %v256_v1 = vld [vmem:[%s2992_s7 + $0x98] sm:$0xff]  ;;  %v2351_v3 = vpack.c.bf16 %v400_v57, %v399_v55  ;;  %v2321_v4 = vpack.c.bf16 %v386_v59, %v385_v58 }
  0x79   : > { %2308 = vmatpush3.bf16.msra.mxu1 %v2307_v25  ;;  %2278 = vmatprep.subr.bf16.mxu0 %v2277_v26  ;;  %v417_v61 = vld [vmem:[#allocation6 + $0x3a0] sm:$0xff]  ;;  %v254_v0 = vld [vmem:[%s2992_s7 + $0x88] sm:$0xff]  ;;  %v255_v7 = vld [vmem:[%s2992_s7 + $0x90] sm:$0xff] }
  0x7a   : > { %2310 = vmatprep.subr.bf16.mxu1 %v2309_v30  ;;  %v253_v2 = vld [vmem:[%s2992_s7 + $0x80] sm:$0xff]  ;;  %v370_v5 = vld [vmem:[#allocation6 + $0x228] sm:$0xff]  ;;  %v2353_v8 = vpack.c.bf16 %v418_v62, %v417_v61  ;;  %v387_v10 = vld [vmem:[#allocation6 + $0x2b0] sm:$0xff] }
  0x7b   : > { %v401_v6 = vld [vmem:[#allocation6 + $0x320] sm:$0xff]  ;;  %v402_v9 = vld [vmem:[#allocation6 + $0x328] sm:$0xff]  ;;  %v388_v11 = vld [vmem:[#allocation6 + $0x2b8] sm:$0xff]  ;;  %v2323_v15 = vpack.c.bf16 %v370_v5, %v369_v60 }
  0x7c   : > { %2280 = vmatpush3.bf16.msra.mxu0 %v2279_v36  ;;  %v371_v12 = vld [vmem:[#allocation6 + $0x230] sm:$0xff]  ;;  %v420_v14 = vld [vmem:[#allocation6 + $0x3b8] sm:$0xff]  ;;  %v270_v16 = vld [vmem:[%s2992_s7 + $0x108] sm:$0xff]  ;;  %v2355_v19 = vpack.c.bf16 %v402_v9, %v401_v6  ;;  %v2325_v20 = vpack.c.bf16 %v388_v11, %v387_v10 }
  0x7d   : > { %2312 = vmatpush3.bf16.msra.mxu1 %v2311_v37  ;;  %2314 = vmatprep.subr.bf16.mxu0 %v2313_v38  ;;  %v419_v13 = vld [vmem:[#allocation6 + $0x3b0] sm:$0xff]  ;;  %v272_v17 = vld [vmem:[%s2992_s7 + $0x118] sm:$0xff]  ;;  %v269_v18 = vld [vmem:[%s2992_s7 + $0x100] sm:$0xff] }
  0x7e   : > { %2346 = vmatprep.subr.bf16.mxu1 %v2345_v42  ;;  %v372_v21 = vld [vmem:[#allocation6 + $0x238] sm:$0xff]  ;;  %v403_v22 = vld [vmem:[#allocation6 + $0x330] sm:$0xff]  ;;  %v2357_v24 = vpack.c.bf16 %v420_v14, %v419_v13  ;;  %v389_v26 = vld [vmem:[#allocation6 + $0x2c0] sm:$0xff] }
  0x7f   : > { %622 = vmatmul.mubr.f32.vlgmr.msra.gmra.mrb[0].mxu0 %v237_v48  ;;  %v271_v23 = vld [vmem:[%s2992_s7 + $0x110] sm:$0xff]  ;;  %v404_v25 = vld [vmem:[#allocation6 + $0x338] sm:$0xff]  ;;  %v390_v27 = vld [vmem:[#allocation6 + $0x2c8] sm:$0xff]  ;;  %v2327_v31 = vpack.c.bf16 %v372_v21, %v371_v12 }
  0x80   : > { %707 = vmatmul.mubr.f32.vlgmr.msra.gmra.mrb[0].mxu1 %v239_v49  ;;  %2316 = vmatpush3.bf16.msra.mxu0 %v2315_v50  ;;  %v373_v28 = vld [vmem:[#allocation6 + $0x240] sm:$0xff]  ;;  %v422_v30 = vld [vmem:[#allocation6 + $0x3c8] sm:$0xff]  ;;  %v288_v33 = vld [vmem:[%s2992_s7 + $0x198] sm:$0xff]  ;;  %v2359_v35 = vpack.c.bf16 %v404_v25, %v403_v22  ;;  %v2329_v36 = vpack.c.bf16 %v390_v27, %v389_v26 }
  0x81   : > { %2348 = vmatpush3.bf16.msra.mxu1 %v2347_v51  ;;  %2318 = vmatprep.subr.bf16.mxu0 %v2317_v52  ;;  %v421_v29 = vld [vmem:[#allocation6 + $0x3c0] sm:$0xff]  ;;  %v286_v32 = vld [vmem:[%s2992_s7 + $0x188] sm:$0xff]  ;;  %v287_v39 = vld [vmem:[%s2992_s7 + $0x190] sm:$0xff] }
  0x82   : > { %2350 = vmatprep.subr.bf16.mxu1 %v2349_v56  ;;  %626 = vmatprep.mubr.f32.mxu0 %v254_v0  ;;  %v285_v34 = vld [vmem:[%s2992_s7 + $0x180] sm:$0xff]  ;;  %v374_v37 = vld [vmem:[#allocation6 + $0x248] sm:$0xff]  ;;  %v2361_v40 = vpack.c.bf16 %v422_v30, %v421_v29  ;;  %v391_v42 = vld [vmem:[#allocation6 + $0x2d0] sm:$0xff] }
  0x83   : > { %711 = vmatprep.mubr.f32.mxu1 %v256_v1  ;;  %627 = vmatmul.mubr.f32.gmra.mrb[2].mxu0 %v253_v2  ;;  %v405_v38 = vld [vmem:[#allocation6 + $0x340] sm:$0xff]  ;;  %v406_v41 = vld [vmem:[#allocation6 + $0x348] sm:$0xff]  ;;  %v392_v43 = vld [vmem:[#allocation6 + $0x2d8] sm:$0xff]  ;;  %v2331_v46 = vpack.c.bf16 %v374_v37, %v373_v28 }
  0x84   : > { %2320 = vmatpush3.bf16.msra.mxu0 %v2319_v63  ;;  %712 = vmatmul.mubr.f32.gmra.mrb[2].mxu1 %v255_v7  ;;  %v423_v44 = vld [vmem:[#allocation6 + $0x3d0] sm:$0xff]  ;;  %v424_v45 = vld [vmem:[#allocation6 + $0x3d8] sm:$0xff]  ;;  %v242_v48 = vld [vmem:[%s2992_s7 + $0x28] sm:$0xff]  ;;  %v2363_v49 = vpack.c.bf16 %v406_v41, %v405_v38  ;;  %v2333_v50 = vpack.c.bf16 %v392_v43, %v391_v42 }
  0x85   : > { %2352 = vmatpush3.bf16.msra.mxu1 %v2351_v3  ;;  %2322 = vmatprep.subr.bf16.mxu0 %v2321_v4  ;;  %v375_v47 = vld [vmem:[#allocation6 + $0x250] sm:$0xff]  ;;  %v376_v51 = vld [vmem:[#allocation6 + $0x258] sm:$0xff]  ;;  %v2365_v54 = vpack.c.bf16 %v424_v45, %v423_v44  ;;  %v393_v56 = vld [vmem:[#allocation6 + $0x2e0] sm:$0xff] }
  0x86   : > { %2354 = vmatprep.subr.bf16.mxu1 %v2353_v8  ;;  %631 = vmatprep.mubr.f32.mxu0 %v270_v16  ;;  %v407_v52 = vld [vmem:[#allocation6 + $0x350] sm:$0xff]  ;;  %v244_v53 = vld [vmem:[%s2992_s7 + $0x38] sm:$0xff]  ;;  %v394_v57 = vld [vmem:[#allocation6 + $0x2e8] sm:$0xff]  ;;  %v2335_v60 = vpack.c.bf16 %v376_v51, %v375_v47 }
  0x87   : > { %716 = vmatprep.mubr.f32.mxu1 %v272_v17  ;;  %632 = vmatmul.mubr.f32.gmra.mrb[4].mxu0 %v269_v18  ;;  %v408_v55 = vld [vmem:[#allocation6 + $0x358] sm:$0xff]  ;;  %v425_v58 = vld [vmem:[#allocation6 + $0x3e0] sm:$0xff]  ;;  %v426_v59 = vld [vmem:[#allocation6 + $0x3e8] sm:$0xff]  ;;  %v2337_v62 = vpack.c.bf16 %v394_v57, %v393_v56 }
  0x88   : > { %2324 = vmatpush3.bf16.msra.mxu0 %v2323_v15  ;;  %717 = vmatmul.mubr.f32.gmra.mrb[4].mxu1 %v271_v23  ;;  %v2367_v61 = vpack.c.bf16 %v408_v55, %v407_v52  ;;  %v377_v63 = vld [vmem:[#allocation6 + $0x260] sm:$0xff]  ;;  %v378_v0 = vld [vmem:[#allocation6 + $0x268] sm:$0xff]  ;;  %v2369_v2 = vpack.c.bf16 %v426_v59, %v425_v58  ;;  %v395_v4 = vld [vmem:[#allocation6 + $0x2f0] sm:$0xff] }
  0x89   : > { %2356 = vmatpush3.bf16.msra.mxu1 %v2355_v19  ;;  %2326 = vmatprep.subr.bf16.mxu0 %v2325_v20  ;;  %v409_v1 = vld [vmem:[#allocation6 + $0x360] sm:$0xff]  ;;  %v410_v3 = vld [vmem:[#allocation6 + $0x368] sm:$0xff]  ;;  %v396_v5 = vld [vmem:[#allocation6 + $0x2f8] sm:$0xff]  ;;  %v2339_v8 = vpack.c.bf16 %v378_v0, %v377_v63 }
  0x8a   : > { %2358 = vmatprep.subr.bf16.mxu1 %v2357_v24  ;;  %636 = vmatprep.mubr.f32.mxu0 %v286_v32  ;;  %v427_v6 = vld [vmem:[#allocation6 + $0x3f0] sm:$0xff]  ;;  %v428_v7 = vld [vmem:[#allocation6 + $0x3f8] sm:$0xff]  ;;  %v2371_v9 = vpack.c.bf16 %v410_v3, %v409_v1  ;;  %v2341_v10 = vpack.c.bf16 %v396_v5, %v395_v4  ;;  %v445_v16 = vld [vmem:[#allocation6 + $0x480] sm:$0xff] }
  0x8b   : > { %721 = vmatprep.mubr.f32.mxu1 %v288_v33  ;;  %637 = vmatmul.mubr.f32.gmra.mrb[6].mxu0 %v285_v34  ;;  %v379_v11 = vld [vmem:[#allocation6 + $0x270] sm:$0xff]  ;;  %v380_v12 = vld [vmem:[#allocation6 + $0x278] sm:$0xff]  ;;  %v2373_v14 = vpack.c.bf16 %v428_v7, %v427_v6  ;;  %v446_v17 = vld [vmem:[#allocation6 + $0x488] sm:$0xff] }
  0x8c   : > { %2328 = vmatpush3.bf16.msra.mxu0 %v2327_v31  ;;  %722 = vmatmul.mubr.f32.gmra.mrb[6].mxu1 %v287_v39  ;;  %v411_v13 = vld [vmem:[#allocation6 + $0x370] sm:$0xff]  ;;  %v412_v15 = vld [vmem:[#allocation6 + $0x378] sm:$0xff]  ;;  %v477_v18 = vld [vmem:[#allocation6 + $0x580] sm:$0xff]  ;;  %v2343_v20 = vpack.c.bf16 %v380_v12, %v379_v11  ;;  %v2377_v22 = vpack.c.bf16 %v446_v17, %v445_v16 }
  0x8d   : > { %2360 = vmatpush3.bf16.msra.mxu1 %v2359_v35  ;;  %2330 = vmatprep.subr.bf16.mxu0 %v2329_v36  ;;  %v478_v19 = vld [vmem:[#allocation6 + $0x588] sm:$0xff]  ;;  %v2375_v21 = vpack.c.bf16 %v412_v15, %v411_v13  ;;  %v429_v23 = vld [vmem:[#allocation6 + $0x400] sm:$0xff]  ;;  %v447_v29 = vld [vmem:[#allocation6 + $0x490] sm:$0xff] }
  0x8e   : > { %2362 = vmatprep.subr.bf16.mxu1 %v2361_v40  ;;  %791 = vmatprep.mubr.f32.mxu0 %v242_v48  ;;  %v430_v24 = vld [vmem:[#allocation6 + $0x408] sm:$0xff]  ;;  %v2409_v25 = vpack.c.bf16 %v478_v19, %v477_v18  ;;  %v461_v26 = vld [vmem:[#allocation6 + $0x500] sm:$0xff]  ;;  %v448_v30 = vld [vmem:[#allocation6 + $0x498] sm:$0xff] }
  0x8f   : > { %876 = vmatprep.mubr.f32.mxu1 %v244_v53  ;;  %v462_v27 = vld [vmem:[#allocation6 + $0x508] sm:$0xff]  ;;  %v241_v28 = vld [vmem:[%s2992_s7 + $0x20] sm:$0xff]  ;;  %v2379_v31 = vpack.c.bf16 %v430_v24, %v429_v23  ;;  %v243_v32 = vld [vmem:[%s2992_s7 + $0x30] sm:$0xff]  ;;  %v2381_v40 = vpack.c.bf16 %v448_v30, %v447_v29 }
  0x90   : > { %2332 = vmatpush3.bf16.msra.mxu0 %v2331_v46  ;;  %v479_v33 = vld [vmem:[#allocation6 + $0x590] sm:$0xff]  ;;  %v480_v34 = vld [vmem:[#allocation6 + $0x598] sm:$0xff]  ;;  %v2411_v35 = vpack.c.bf16 %v462_v27, %v461_v26  ;;  %v258_v36 = vld [vmem:[%s2992_s7 + $0xa8] sm:$0xff] }
  0x91   : > { %2364 = vmatpush3.bf16.msra.mxu1 %v2363_v49  ;;  %2334 = vmatprep.subr.bf16.mxu0 %v2333_v50  ;;  %v431_v37 = vld [vmem:[#allocation6 + $0x410] sm:$0xff]  ;;  %v432_v38 = vld [vmem:[#allocation6 + $0x418] sm:$0xff]  ;;  %v257_v39 = vld [vmem:[%s2992_s7 + $0xa0] sm:$0xff]  ;;  %v2413_v44 = vpack.c.bf16 %v480_v34, %v479_v33 }
  0x92   : > { %2366 = vmatprep.subr.bf16.mxu1 %v2365_v54  ;;  %v463_v41 = vld [vmem:[#allocation6 + $0x510] sm:$0xff]  ;;  %v464_v42 = vld [vmem:[#allocation6 + $0x518] sm:$0xff]  ;;  %v449_v45 = vld [vmem:[#allocation6 + $0x4a0] sm:$0xff]  ;;  %v2383_v47 = vpack.c.bf16 %v432_v38, %v431_v37 }
  0x93   : > { %v260_v43 = vld [vmem:[%s2992_s7 + $0xb8] sm:$0xff]  ;;  %v450_v46 = vld [vmem:[#allocation6 + $0x4a8] sm:$0xff]  ;;  %v259_v48 = vld [vmem:[%s2992_s7 + $0xb0] sm:$0xff]  ;;  %v2415_v51 = vpack.c.bf16 %v464_v42, %v463_v41 }
  0x94   : > { %2336 = vmatpush3.bf16.msra.mxu0 %v2335_v60  ;;  %v481_v49 = vld [vmem:[#allocation6 + $0x5a0] sm:$0xff]  ;;  %v482_v50 = vld [vmem:[#allocation6 + $0x5a8] sm:$0xff]  ;;  %v2385_v56 = vpack.c.bf16 %v450_v46, %v449_v45  ;;  %v276_v57 = vld [vmem:[%s2992_s7 + $0x138] sm:$0xff] }
  0x95   : > { %2368 = vmatpush3.bf16.msra.mxu1 %v2367_v61  ;;  %2338 = vmatprep.subr.bf16.mxu0 %v2337_v62  ;;  %v274_v52 = vld [vmem:[%s2992_s7 + $0x128] sm:$0xff]  ;;  %v433_v53 = vld [vmem:[#allocation6 + $0x420] sm:$0xff]  ;;  %v2417_v60 = vpack.c.bf16 %v482_v50, %v481_v49  ;;  %v275_v61 = vld [vmem:[%s2992_s7 + $0x130] sm:$0xff] }
  0x96   : > { %2370 = vmatprep.subr.bf16.mxu1 %v2369_v2  ;;  %v434_v54 = vld [vmem:[#allocation6 + $0x428] sm:$0xff]  ;;  %v273_v55 = vld [vmem:[%s2992_s7 + $0x120] sm:$0xff]  ;;  %v451_v62 = vld [vmem:[#allocation6 + $0x4b0] sm:$0xff] }
  0x97   : > { %v465_v58 = vld [vmem:[#allocation6 + $0x520] sm:$0xff]  ;;  %v466_v59 = vld [vmem:[#allocation6 + $0x528] sm:$0xff]  ;;  %v452_v63 = vld [vmem:[#allocation6 + $0x4b8] sm:$0xff]  ;;  %v2387_v0 = vpack.c.bf16 %v434_v54, %v433_v53 }
  0x98   : > { %2340 = vmatpush3.bf16.msra.mxu0 %v2339_v8  ;;  %v290_v1 = vld [vmem:[%s2992_s7 + $0x1a8] sm:$0xff]  ;;  %v483_v2 = vld [vmem:[#allocation6 + $0x5b0] sm:$0xff]  ;;  %v484_v3 = vld [vmem:[#allocation6 + $0x5b8] sm:$0xff]  ;;  %v2419_v4 = vpack.c.bf16 %v466_v59, %v465_v58  ;;  %v2389_v8 = vpack.c.bf16 %v452_v63, %v451_v62 }
  0x99   : > { %2372 = vmatpush3.bf16.msra.mxu1 %v2371_v9  ;;  %2342 = vmatprep.subr.bf16.mxu0 %v2341_v10  ;;  %v435_v5 = vld [vmem:[#allocation6 + $0x430] sm:$0xff]  ;;  %v436_v6 = vld [vmem:[#allocation6 + $0x438] sm:$0xff]  ;;  %v453_v10 = vld [vmem:[#allocation6 + $0x4c0] sm:$0xff]  ;;  %v2421_v13 = vpack.c.bf16 %v484_v3, %v483_v2 }
  0x9a   : > { %2374 = vmatprep.subr.bf16.mxu1 %v2373_v14  ;;  %v467_v7 = vld [vmem:[#allocation6 + $0x530] sm:$0xff]  ;;  %v468_v9 = vld [vmem:[#allocation6 + $0x538] sm:$0xff]  ;;  %v454_v11 = vld [vmem:[#allocation6 + $0x4c8] sm:$0xff]  ;;  %v2391_v17 = vpack.c.bf16 %v436_v6, %v435_v5 }
  0x9b   : > { %v292_v12 = vld [vmem:[%s2992_s7 + $0x1b8] sm:$0xff]  ;;  %v485_v14 = vld [vmem:[#allocation6 + $0x5c0] sm:$0xff]  ;;  %v486_v15 = vld [vmem:[#allocation6 + $0x5c8] sm:$0xff]  ;;  %v2423_v19 = vpack.c.bf16 %v468_v9, %v467_v7 }
  0x9c   : > { %2344 = vmatpush3.bf16.msra.mxu0 %v2343_v20  ;;  %v289_v16 = vld [vmem:[%s2992_s7 + $0x1a0] sm:$0xff]  ;;  %v291_v18 = vld [vmem:[%s2992_s7 + $0x1b0] sm:$0xff]  ;;  %v2393_v20 = vpack.c.bf16 %v454_v11, %v453_v10  ;;  %v2425_v24 = vpack.c.bf16 %v486_v15, %v485_v14  ;;  %v456_v27 = vld [vmem:[#allocation6 + $0x4d8] sm:$0xff] }
  0x9d   : > { %2376 = vmatpush3.bf16.msra.mxu1 %v2375_v21  ;;  %2378 = vmatprep.subr.bf16.mxu0 %v2377_v22  ;;  %v437_v21 = vld [vmem:[#allocation6 + $0x440] sm:$0xff]  ;;  %v438_v22 = vld [vmem:[#allocation6 + $0x448] sm:$0xff]  ;;  %v455_v26 = vld [vmem:[#allocation6 + $0x4d0] sm:$0xff] }
  0x9e   : > { %2410 = vmatprep.subr.bf16.mxu1 %v2409_v25  ;;  %v469_v23 = vld [vmem:[#allocation6 + $0x540] sm:$0xff]  ;;  %v470_v25 = vld [vmem:[#allocation6 + $0x548] sm:$0xff]  ;;  %v488_v29 = vld [vmem:[#allocation6 + $0x5d8] sm:$0xff]  ;;  %v2397_v34 = vpack.c.bf16 %v456_v27, %v455_v26 }
  0x9f   : > { %792 = vmatmul.mubr.f32.vlgmr.msra.gmra.mrb[8].mxu0 %v241_v28  ;;  %v487_v28 = vld [vmem:[#allocation6 + $0x5d0] sm:$0xff]  ;;  %v246_v30 = vld [vmem:[%s2992_s7 + $0x48] sm:$0xff]  ;;  %v2427_v33 = vpack.c.bf16 %v470_v25, %v469_v23  ;;  %v489_v42 = vld [vmem:[#allocation6 + $0x5e0] sm:$0xff] }
  0xa0   : > { %2380 = vmatpush3.bf16.msra.mxu0 %v2379_v31  ;;  %877 = vmatmul.mubr.f32.vlgmr.msra.gmra.mrb[8].mxu1 %v243_v32  ;;  %v2395_v31 = vpack.c.bf16 %v438_v22, %v437_v21  ;;  %v248_v32 = vld [vmem:[%s2992_s7 + $0x58] sm:$0xff]  ;;  %v471_v37 = vld [vmem:[#allocation6 + $0x550] sm:$0xff]  ;;  %v2429_v38 = vpack.c.bf16 %v488_v29, %v487_v28  ;;  %v458_v41 = vld [vmem:[#allocation6 + $0x4e8] sm:$0xff] }
  0xa1   : > { %2412 = vmatpush3.bf16.msra.mxu1 %v2411_v35  ;;  %796 = vmatprep.mubr.f32.mxu0 %v258_v36  ;;  %v439_v35 = vld [vmem:[#allocation6 + $0x450] sm:$0xff]  ;;  %v440_v36 = vld [vmem:[#allocation6 + $0x458] sm:$0xff]  ;;  %v473_v49 = vld [vmem:[#allocation6 + $0x560] sm:$0xff] }
  0xa2   : > { %2382 = vmatprep.subr.bf16.mxu0 %v2381_v40  ;;  %881 = vmatprep.mubr.f32.mxu1 %v260_v43  ;;  %v457_v40 = vld [vmem:[#allocation6 + $0x4e0] sm:$0xff]  ;;  %v490_v43 = vld [vmem:[#allocation6 + $0x5e8] sm:$0xff]  ;;  %v460_v53 = vld [vmem:[#allocation6 + $0x4f8] sm:$0xff] }
  0xa3   : > { %797 = vmatmul.mubr.f32.gmra.mrb[10].mxu0 %v257_v39  ;;  %2414 = vmatprep.subr.bf16.mxu1 %v2413_v44  ;;  %v472_v39 = vld [vmem:[#allocation6 + $0x558] sm:$0xff]  ;;  %v2399_v44 = vpack.c.bf16 %v440_v36, %v439_v35  ;;  %v2401_v46 = vpack.c.bf16 %v458_v41, %v457_v40  ;;  %v2433_v50 = vpack.c.bf16 %v490_v43, %v489_v42  ;;  %v491_v54 = vld [vmem:[#allocation6 + $0x5f0] sm:$0xff]  ;;  %v541_v2 = vld [vmem:[#allocation6 + $0x780] sm:$0xff] }
  0xa4   : > { %2384 = vmatpush3.bf16.msra.mxu0 %v2383_v47  ;;  %882 = vmatmul.mubr.f32.gmra.mrb[10].mxu1 %v259_v48  ;;  %v2431_v45 = vpack.c.bf16 %v472_v39, %v471_v37  ;;  %v441_v47 = vld [vmem:[#allocation6 + $0x460] sm:$0xff]  ;;  %v442_v48 = vld [vmem:[#allocation6 + $0x468] sm:$0xff]  ;;  %v443_v59 = vld [vmem:[#allocation6 + $0x470] sm:$0xff] }
  0xa5   : > { %2416 = vmatpush3.bf16.msra.mxu1 %v2415_v51  ;;  %801 = vmatprep.mubr.f32.mxu0 %v274_v52  ;;  %v474_v51 = vld [vmem:[#allocation6 + $0x568] sm:$0xff]  ;;  %v459_v52 = vld [vmem:[#allocation6 + $0x4f0] sm:$0xff]  ;;  %v476_v63 = vld [vmem:[#allocation6 + $0x578] sm:$0xff] }
  0xa6   : > { %2386 = vmatprep.subr.bf16.mxu0 %v2385_v56  ;;  %886 = vmatprep.mubr.f32.mxu1 %v276_v57  ;;  %v2403_v56 = vpack.c.bf16 %v442_v48, %v441_v47  ;;  %v2435_v57 = vpack.c.bf16 %v474_v51, %v473_v49  ;;  %v2405_v58 = vpack.c.bf16 %v460_v53, %v459_v52  ;;  %v542_v3 = vld [vmem:[#allocation6 + $0x788] sm:$0xff]  ;;  %v493_v7 = vld [vmem:[#allocation6 + $0x600] sm:$0xff]  ;;  %v512_v14 = vld [vmem:[#allocation6 + $0x698] sm:$0xff] }
  0xa7   : > { %802 = vmatmul.mubr.f32.gmra.mrb[12].mxu0 %v273_v55  ;;  %2418 = vmatprep.subr.bf16.mxu1 %v2417_v60  ;;  %v492_v55 = vld [vmem:[#allocation6 + $0x5f8] sm:$0xff]  ;;  %v2473_v9 = vpack.c.bf16 %v542_v3, %v541_v2  ;;  %v525_v10 = vld [vmem:[#allocation6 + $0x700] sm:$0xff]  ;;  %v526_v11 = vld [vmem:[#allocation6 + $0x708] sm:$0xff] }
  0xa8   : > { %2388 = vmatpush3.bf16.msra.mxu0 %v2387_v0  ;;  %887 = vmatmul.mubr.f32.gmra.mrb[12].mxu1 %v275_v61  ;;  %v444_v60 = vld [vmem:[#allocation6 + $0x478] sm:$0xff]  ;;  %v475_v61 = vld [vmem:[#allocation6 + $0x570] sm:$0xff]  ;;  %v2437_v62 = vpack.c.bf16 %v492_v55, %v491_v54  ;;  %v509_v0 = vld [vmem:[#allocation6 + $0x680] sm:$0xff] }
  0xa9   : > { %2420 = vmatpush3.bf16.msra.mxu1 %v2419_v4  ;;  %806 = vmatprep.mubr.f32.mxu0 %v290_v1  ;;  %v510_v1 = vld [vmem:[#allocation6 + $0x688] sm:$0xff]  ;;  %v2407_v4 = vpack.c.bf16 %v444_v60, %v443_v59  ;;  %v2439_v5 = vpack.c.bf16 %v476_v63, %v475_v61  ;;  %v495_v21 = vld [vmem:[#allocation6 + $0x610] sm:$0xff]  ;;  %v496_v22 = vld [vmem:[#allocation6 + $0x618] sm:$0xff] }
  0xaa   : > { %2390 = vmatprep.subr.bf16.mxu0 %v2389_v8  ;;  %891 = vmatprep.mubr.f32.mxu1 %v292_v12  ;;  %v2441_v6 = vpack.c.bf16 %v510_v1, %v509_v0  ;;  %v494_v8 = vld [vmem:[#allocation6 + $0x608] sm:$0xff]  ;;  %v245_v12 = vld [vmem:[%s2992_s7 + $0x40] sm:$0xff]  ;;  %v527_v25 = vld [vmem:[#allocation6 + $0x710] sm:$0xff] }
  0xab   : > { %807 = vmatmul.mubr.f32.gmra.mrb[14].mxu0 %v289_v16  ;;  %2422 = vmatprep.subr.bf16.mxu1 %v2421_v13  ;;  %v511_v13 = vld [vmem:[#allocation6 + $0x690] sm:$0xff]  ;;  %v2443_v15 = vpack.c.bf16 %v494_v8, %v493_v7  ;;  %v261_v23 = vld [vmem:[%s2992_s7 + $0xc0] sm:$0xff]  ;;  %v528_v26 = vld [vmem:[#allocation6 + $0x718] sm:$0xff] }
  0xac   : > { %2392 = vmatpush3.bf16.msra.mxu0 %v2391_v17  ;;  %892 = vmatmul.mubr.f32.gmra.mrb[14].mxu1 %v291_v18  ;;  %v247_v16 = vld [vmem:[%s2992_s7 + $0x50] sm:$0xff]  ;;  %v544_v18 = vld [vmem:[#allocation6 + $0x798] sm:$0xff]  ;;  %v513_v29 = vld [vmem:[#allocation6 + $0x6a0] sm:$0xff]  ;;  %v2479_v35 = vpack.c.bf16 %v528_v26, %v527_v25 }
  0xad   : > { %2424 = vmatpush3.bf16.msra.mxu1 %v2423_v19  ;;  %2394 = vmatprep.subr.bf16.mxu0 %v2393_v20  ;;  %v543_v17 = vld [vmem:[#allocation6 + $0x790] sm:$0xff]  ;;  %v2475_v19 = vpack.c.bf16 %v526_v11, %v525_v10  ;;  %v262_v20 = vld [vmem:[%s2992_s7 + $0xc8] sm:$0xff]  ;;  %v264_v27 = vld [vmem:[%s2992_s7 + $0xd8] sm:$0xff] }
  0xae   : > { %2426 = vmatprep.subr.bf16.mxu1 %v2425_v24  ;;  %961 = vmatprep.mubr.f32.mxu0 %v246_v30  ;;  %v2445_v24 = vpack.c.bf16 %v512_v14, %v511_v13  ;;  %v2477_v28 = vpack.c.bf16 %v544_v18, %v543_v17  ;;  %v514_v30 = vld [vmem:[#allocation6 + $0x6a8] sm:$0xff]  ;;  %v497_v37 = vld [vmem:[#allocation6 + $0x620] sm:$0xff]  ;;  %v280_v41 = vld [vmem:[%s2992_s7 + $0x158] sm:$0xff] }
  0xaf   : > { %1046 = vmatprep.mubr.f32.mxu1 %v248_v32  ;;  %v263_v32 = vld [vmem:[%s2992_s7 + $0xd0] sm:$0xff]  ;;  %v278_v36 = vld [vmem:[%s2992_s7 + $0x148] sm:$0xff]  ;;  %v277_v39 = vld [vmem:[%s2992_s7 + $0x140] sm:$0xff]  ;;  %v2449_v40 = vpack.c.bf16 %v514_v30, %v513_v29 }
  0xb0   : > { %2396 = vmatpush3.bf16.msra.mxu0 %v2395_v31  ;;  %v2447_v31 = vpack.c.bf16 %v496_v22, %v495_v21  ;;  %v529_v42 = vld [vmem:[#allocation6 + $0x720] sm:$0xff]  ;;  %v530_v43 = vld [vmem:[#allocation6 + $0x728] sm:$0xff]  ;;  %v516_v47 = vld [vmem:[#allocation6 + $0x6b8] sm:$0xff] }
  0xb1   : > { %2428 = vmatpush3.bf16.msra.mxu1 %v2427_v33  ;;  %2398 = vmatprep.subr.bf16.mxu0 %v2397_v34  ;;  %v545_v33 = vld [vmem:[#allocation6 + $0x7a0] sm:$0xff]  ;;  %v546_v34 = vld [vmem:[#allocation6 + $0x7a8] sm:$0xff]  ;;  %v548_v51 = vld [vmem:[#allocation6 + $0x7b8] sm:$0xff]  ;;  %v2483_v52 = vpack.c.bf16 %v530_v43, %v529_v42 }
  0xb2   : > { %2430 = vmatprep.subr.bf16.mxu1 %v2429_v38  ;;  %v498_v38 = vld [vmem:[#allocation6 + $0x628] sm:$0xff]  ;;  %v499_v53 = vld [vmem:[#allocation6 + $0x630] sm:$0xff]  ;;  %v500_v54 = vld [vmem:[#allocation6 + $0x638] sm:$0xff] }
  0xb3   : > { %v2451_v48 = vpack.c.bf16 %v498_v38, %v497_v37  ;;  %v294_v49 = vld [vmem:[%s2992_s7 + $0x1c8] sm:$0xff]  ;;  %v531_v55 = vld [vmem:[#allocation6 + $0x730] sm:$0xff]  ;;  %v296_v60 = vld [vmem:[%s2992_s7 + $0x1d8] sm:$0xff]  ;;  %v2455_v1 = vpack.c.bf16 %v500_v54, %v499_v53 }
  0xb4   : > { %2400 = vmatpush3.bf16.msra.mxu0 %v2399_v44  ;;  %v2481_v44 = vpack.c.bf16 %v546_v34, %v545_v33  ;;  %v518_v59 = vld [vmem:[#allocation6 + $0x6c8] sm:$0xff]  ;;  %v293_v0 = vld [vmem:[%s2992_s7 + $0x1c0] sm:$0xff]  ;;  %v295_v2 = vld [vmem:[%s2992_s7 + $0x1d0] sm:$0xff] }
  0xb5   : > { %2432 = vmatpush3.bf16.msra.mxu1 %v2431_v45  ;;  %2402 = vmatprep.subr.bf16.mxu0 %v2401_v46  ;;  %v279_v45 = vld [vmem:[%s2992_s7 + $0x150] sm:$0xff]  ;;  %v550_v63 = vld [vmem:[#allocation6 + $0x7c8] sm:$0xff]  ;;  %v533_v7 = vld [vmem:[#allocation6 + $0x740] sm:$0xff] }
  0xb6   : > { %2434 = vmatprep.subr.bf16.mxu1 %v2433_v50  ;;  %v515_v46 = vld [vmem:[#allocation6 + $0x6b0] sm:$0xff]  ;;  %v520_v11 = vld [vmem:[#allocation6 + $0x6d8] sm:$0xff]  ;;  %v250_v14 = vld [vmem:[%s2992_s7 + $0x68] sm:$0xff] }
  0xb7   : > { %v547_v50 = vld [vmem:[#allocation6 + $0x7b0] sm:$0xff]  ;;  %v552_v13 = vld [vmem:[#allocation6 + $0x7d8] sm:$0xff]  ;;  %v522_v25 = vld [vmem:[#allocation6 + $0x6e8] sm:$0xff] }
  0xb8   : > { %2404 = vmatpush3.bf16.msra.mxu0 %v2403_v56  ;;  %v2453_v56 = vpack.c.bf16 %v516_v47, %v515_v46  ;;  %v2485_v61 = vpack.c.bf16 %v548_v51, %v547_v50  ;;  %v519_v10 = vld [vmem:[#allocation6 + $0x6d0] sm:$0xff]  ;;  %v553_v26 = vld [vmem:[#allocation6 + $0x7e0] sm:$0xff]  ;;  %v524_v37 = vld [vmem:[#allocation6 + $0x6f8] sm:$0xff] }
  0xb9   : > { %2436 = vmatpush3.bf16.msra.mxu1 %v2435_v57  ;;  %2406 = vmatprep.subr.bf16.mxu0 %v2405_v58  ;;  %v532_v57 = vld [vmem:[#allocation6 + $0x738] sm:$0xff]  ;;  %v517_v58 = vld [vmem:[#allocation6 + $0x6c0] sm:$0xff]  ;;  %v2461_v18 = vpack.c.bf16 %v520_v11, %v519_v10  ;;  %v535_v21 = vld [vmem:[#allocation6 + $0x750] sm:$0xff]  ;;  %v2806_v10 = vmov 1.0|1.0  }
  0xba   : > { %2438 = vmatprep.subr.bf16.mxu1 %v2437_v62  ;;  %v549_v62 = vld [vmem:[#allocation6 + $0x7c0] sm:$0xff]  ;;  %v2487_v3 = vpack.c.bf16 %v532_v57, %v531_v55  ;;  %v555_v38 = vld [vmem:[#allocation6 + $0x7f0] sm:$0xff]  ;;  %v540_v47 = vld [vmem:[#allocation6 + $0x778] sm:$0xff] }
  0xbb   : > { %v2489_v8 = vpack.c.bf16 %v550_v63, %v549_v62  ;;  %v537_v33 = vld [vmem:[#allocation6 + $0x760] sm:$0xff]  ;;  %v507_v43 = vld [vmem:[#allocation6 + $0x670] sm:$0xff]  ;;  %v268_v53 = vld [vmem:[%s2992_s7 + $0xf8] sm:$0xff] }
  0xbc   : > { %2408 = vmatpush3.bf16.msra.mxu0 %v2407_v4  ;;  %v2457_v4 = vpack.c.bf16 %v518_v59, %v517_v58  ;;  %v539_v46 = vld [vmem:[#allocation6 + $0x770] sm:$0xff]  ;;  %v249_v50 = vld [vmem:[%s2992_s7 + $0x60] sm:$0xff]  ;;  %v284_v57 = vld [vmem:[%s2992_s7 + $0x178] sm:$0xff] }
  0xbd   : > { %2440 = vmatpush3.bf16.msra.mxu1 %v2439_v5  ;;  %2442 = vmatprep.subr.bf16.mxu0 %v2441_v6  ;;  %v501_v5 = vld [vmem:[#allocation6 + $0x640] sm:$0xff]  ;;  %v502_v6 = vld [vmem:[#allocation6 + $0x648] sm:$0xff]  ;;  %v251_v51 = vld [vmem:[%s2992_s7 + $0x70] sm:$0xff] }
  0xbe   : > { %2474 = vmatprep.subr.bf16.mxu1 %v2473_v9  ;;  %v534_v9 = vld [vmem:[#allocation6 + $0x748] sm:$0xff]  ;;  %v265_v54 = vld [vmem:[%s2992_s7 + $0xe0] sm:$0xff]  ;;  %v267_v55 = vld [vmem:[%s2992_s7 + $0xf0] sm:$0xff] }
  0xbf   : > { %962 = vmatmul.mubr.f32.vlgmr.msra.gmra.mrb[16].mxu0 %v245_v12  ;;  %v551_v12 = vld [vmem:[#allocation6 + $0x7d0] sm:$0xff]  ;;  %v2491_v17 = vpack.c.bf16 %v534_v9, %v533_v7  ;;  %v281_v58 = vld [vmem:[%s2992_s7 + $0x160] sm:$0xff] }
  0xc0   : > { %2444 = vmatpush3.bf16.msra.mxu0 %v2443_v15  ;;  %1047 = vmatmul.mubr.f32.vlgmr.msra.gmra.mrb[16].mxu1 %v247_v16  ;;  %v2459_v15 = vpack.c.bf16 %v502_v6, %v501_v5  ;;  %v252_v16 = vld [vmem:[%s2992_s7 + $0x78] sm:$0xff]  ;;  %v2493_v22 = vpack.c.bf16 %v552_v13, %v551_v12  ;;  %v283_v59 = vld [vmem:[%s2992_s7 + $0x170] sm:$0xff]  ;;  %v297_v62 = vld [vmem:[%s2992_s7 + $0x1e0] sm:$0xff] }
  0xc1   : > { %2476 = vmatpush3.bf16.msra.mxu1 %v2475_v19  ;;  %966 = vmatprep.mubr.f32.mxu0 %v262_v20  ;;  %v503_v19 = vld [vmem:[#allocation6 + $0x650] sm:$0xff]  ;;  %v504_v20 = vld [vmem:[#allocation6 + $0x658] sm:$0xff] }
  0xc2   : > { %2446 = vmatprep.subr.bf16.mxu0 %v2445_v24  ;;  %1051 = vmatprep.mubr.f32.mxu1 %v264_v27  ;;  %v521_v24 = vld [vmem:[#allocation6 + $0x6e0] sm:$0xff]  ;;  %v554_v27 = vld [vmem:[#allocation6 + $0x7e8] sm:$0xff]  ;;  %v299_v63 = vld [vmem:[%s2992_s7 + $0x1f0] sm:$0xff] }
  0xc3   : > { %967 = vmatmul.mubr.f32.gmra.mrb[18].mxu0 %v261_v23  ;;  %2478 = vmatprep.subr.bf16.mxu1 %v2477_v28  ;;  %v536_v23 = vld [vmem:[#allocation6 + $0x758] sm:$0xff]  ;;  %v2463_v28 = vpack.c.bf16 %v504_v20, %v503_v19  ;;  %v2465_v30 = vpack.c.bf16 %v522_v25, %v521_v24  ;;  %v2497_v34 = vpack.c.bf16 %v554_v27, %v553_v26  ;;  %v2807_v25 = vmov 0.0  }
  0xc4   : > { %2448 = vmatpush3.bf16.msra.mxu0 %v2447_v31  ;;  %1052 = vmatmul.mubr.f32.gmra.mrb[18].mxu1 %v263_v32  ;;  %v2495_v29 = vpack.c.bf16 %v536_v23, %v535_v21  ;;  %v505_v31 = vld [vmem:[#allocation6 + $0x660] sm:$0xff]  ;;  %v506_v32 = vld [vmem:[#allocation6 + $0x668] sm:$0xff]  ;;  %236 = vst [vmem:[#allocation2] sm:$0x1] %v2807_v25 }
  0xc5   : > { %2480 = vmatpush3.bf16.msra.mxu1 %v2479_v35  ;;  %971 = vmatprep.mubr.f32.mxu0 %v278_v36  ;;  %v538_v35 = vld [vmem:[#allocation6 + $0x768] sm:$0xff]  ;;  %v523_v36 = vld [vmem:[#allocation6 + $0x6f0] sm:$0xff] }
  0xc6   : > { %2450 = vmatprep.subr.bf16.mxu0 %v2449_v40  ;;  %1056 = vmatprep.mubr.f32.mxu1 %v280_v41  ;;  %v2467_v40 = vpack.c.bf16 %v506_v32, %v505_v31  ;;  %v2499_v41 = vpack.c.bf16 %v538_v35, %v537_v33  ;;  %v2469_v42 = vpack.c.bf16 %v524_v37, %v523_v36 }
  0xc7   : > { %972 = vmatmul.mubr.f32.gmra.mrb[20].mxu0 %v277_v39  ;;  %2482 = vmatprep.subr.bf16.mxu1 %v2481_v44  ;;  %v556_v39 = vld [vmem:[#allocation6 + $0x7f8] sm:$0xff] }
  0xc8   : > { %2452 = vmatpush3.bf16.msra.mxu0 %v2451_v48  ;;  %1057 = vmatmul.mubr.f32.gmra.mrb[20].mxu1 %v279_v45  ;;  %v508_v44 = vld [vmem:[#allocation6 + $0x678] sm:$0xff]  ;;  %v2501_v45 = vpack.c.bf16 %v556_v39, %v555_v38 }
  0xc9   : > { %2484 = vmatpush3.bf16.msra.mxu1 %v2483_v52  ;;  %976 = vmatprep.mubr.f32.mxu0 %v294_v49  ;;  %v2471_v48 = vpack.c.bf16 %v508_v44, %v507_v43  ;;  %v2503_v49 = vpack.c.bf16 %v540_v47, %v539_v46  ;;  %v266_v52 = vld [vmem:[%s2992_s7 + $0xe8] sm:$0xff] }
  0xca   : > { %2454 = vmatprep.subr.bf16.mxu0 %v2453_v56  ;;  %1061 = vmatprep.mubr.f32.mxu1 %v296_v60  ;;  %v282_v56 = vld [vmem:[%s2992_s7 + $0x168] sm:$0xff] }
  0xcb   : > { %977 = vmatmul.mubr.f32.gmra.mrb[22].mxu0 %v293_v0  ;;  %2486 = vmatprep.subr.bf16.mxu1 %v2485_v61  ;;  %v298_v60 = vld [vmem:[%s2992_s7 + $0x1e8] sm:$0xff]  ;;  %v300_v61 = vld [vmem:[%s2992_s7 + $0x1f8] sm:$0xff]  ;;  %v1263_v0 = vlaneseq }
  0xcc   : > { %2456 = vmatpush3.bf16.msra.mxu0 %v2455_v1  ;;  %1062 = vmatmul.mubr.f32.gmra.mrb[22].mxu1 %v295_v2 }
  0xcd   : > { %2488 = vmatpush3.bf16.msra.mxu1 %v2487_v3  ;;  %2458 = vmatprep.subr.bf16.mxu0 %v2457_v4  ;;  %v3066_v1 = vshrl.u32 %v1263_v0, 7  ;;  %v1473_v3 = vand.u32 127, %v1263_v0 }
  0xce   : > { %2490 = vmatprep.subr.bf16.mxu1 %v2489_v8  ;;  %1131 = vmatprep.mubr.f32.mxu0 %v250_v14  ;;  %v2805_v8 = vmov 0.0|0.0  }
  0xcf   : > { %1216 = vmatprep.mubr.f32.mxu1 %v252_v16  ;;  %v1265_v2 = vadd.s32 8, %v3066_v1  ;;  %v1284_v4 = vand.u32 3, %v3066_v1  ;;  %v3070_v6 = vand.u32 3, %v1473_v3  ;;  %v1266_v7 = vadd.s32 16, %v3066_v1 }
  0xd0   : > { %2460 = vmatpush3.bf16.msra.mxu0 %v2459_v15  ;;  %v1267_v9 = vadd.s32 24, %v3066_v1  ;;  %v1268_v13 = vadd.s32 32, %v3066_v1  ;;  %v1269_v14 = vadd.s32 40, %v3066_v1  ;;  %v1272_v21 = vadd.s32 64, %v3066_v1 }
  0xd1   : > { %2492 = vmatpush3.bf16.msra.mxu1 %v2491_v17  ;;  %2462 = vmatprep.subr.bf16.mxu0 %v2461_v18  ;;  %v1291_v5 = vand.u32 3, %v1265_v2  ;;  %vm1486_vm0 = vcmp.eq.s32.totalorder %v1284_v4, %v3070_v6  ;;  %v1298_v11 = vand.u32 3, %v1266_v7  ;;  %v1270_v17 = vadd.s32 48, %v3066_v1 }
  0xd2   : > { %2494 = vmatprep.subr.bf16.mxu1 %v2493_v22  ;;  %v1305_v12 = vand.u32 3, %v1267_v9  ;;  %v1312_v15 = vand.u32 3, %v1268_v13  ;;  %v1319_v16 = vand.u32 3, %v1269_v14  ;;  %v1271_v18 = vadd.s32 56, %v3066_v1 }
  0xd3   : > { %vm1487_vm1 = vcmp.eq.s32.totalorder %v1291_v5, %v3070_v6  ;;  %vm1488_vm3 = vcmp.eq.s32.totalorder %v1298_v11, %v3070_v6  ;;  %v1326_v19 = vand.u32 3, %v1270_v17  ;;  %v1273_v22 = vadd.s32 72, %v3066_v1 }
  0xd4   : > { %2464 = vmatpush3.bf16.msra.mxu0 %v2463_v28  ;;  %vm2506_vm2 = vmpackc.low %vm1487_vm1, %vm1486_vm0  ;;  %vm1489_vm4 = vcmp.eq.s32.totalorder %v1305_v12, %v3070_v6  ;;  %vm1490_vm6 = vcmp.eq.s32.totalorder %v1312_v15, %v3070_v6  ;;  %vm1491_vm7 = vcmp.eq.s32.totalorder %v1319_v16, %v3070_v6  ;;  %v1333_v20 = vand.u32 3, %v1271_v18 }
  0xd5   : > { %2496 = vmatpush3.bf16.msra.mxu1 %v2495_v29  ;;  %2466 = vmatprep.subr.bf16.mxu0 %v2465_v30  ;;  %vm2509_vm5 = vmpackc.low %vm1489_vm4, %vm1488_vm3  ;;  %vm1492_vm9 = vcmp.eq.s32.totalorder %v1326_v19, %v3070_v6  ;;  %v1340_v23 = vand.u32 3, %v1272_v21  ;;  %v1347_v24 = vand.u32 3, %v1273_v22  ;;  %v1274_v26 = vadd.s32 80, %v3066_v1 }
  0xd6   : > { %2498 = vmatprep.subr.bf16.mxu1 %v2497_v34  ;;  %vm2512_vm8 = vmpackc.low %vm1491_vm7, %vm1490_vm6  ;;  %vm1493_vm10 = vcmp.eq.s32.totalorder %v1333_v20, %v3070_v6  ;;  %v1275_v27 = vadd.s32 88, %v3066_v1  ;;  %v1276_v35 = vadd.s32 96, %v3066_v1  ;;  %v1277_v37 = vadd.s32 104, %v3066_v1 }
  0xd7   : > { %vm2515_vm11 = vmpackc.low %vm1493_vm10, %vm1492_vm9  ;;  %vm1494_vm12 = vcmp.eq.s32.totalorder %v1340_v23, %v3070_v6  ;;  %vm1495_vm13 = vcmp.eq.s32.totalorder %v1347_v24, %v3070_v6  ;;  %v1354_v29 = vand.u32 3, %v1274_v26  ;;  %v1278_v38 = vadd.s32 112, %v3066_v1 }
  0xd8   : > { %2468 = vmatpush3.bf16.msra.mxu0 %v2467_v40  ;;  %vm2518_vm14 = vmpackc.low %vm1495_vm13, %vm1494_vm12  ;;  %v1361_v30 = vand.u32 3, %v1275_v27  ;;  %v1279_v39 = vadd.s32 120, %v3066_v1  ;;  %vm2808_vm6 = vmmov 0  }
  0xd9   : > { %2500 = vmatpush3.bf16.msra.mxu1 %v2499_v41  ;;  %2470 = vmatprep.subr.bf16.mxu0 %v2469_v42  ;;  %vm1496_vm15 = vcmp.eq.s32.totalorder %v1354_v29, %v3070_v6  ;;  %v1368_v41 = vand.u32 3, %v1276_v35  ;;  %v1382_v46 = vand.u32 3, %v1278_v38 }
  0xda   : > { %2502 = vmatprep.subr.bf16.mxu1 %v2501_v45  ;;  %vm1497_vm0 = vcmp.eq.s32.totalorder %v1361_v30, %v3070_v6  ;;  %v1375_v45 = vand.u32 3, %v1277_v37  ;;  %v1389_v47 = vand.u32 3, %v1279_v39 }
  0xdb   : > { %vm2521_vm1 = vmpackc.low %vm1497_vm0, %vm1496_vm15  ;;  %vm3114_vm4 = vcmp.eq.s32.totalorder %v1382_v46, %v3070_v6 }
  0xdc   : > { %2472 = vmatpush3.bf16.msra.mxu0 %v2471_v48  ;;  %vm1499_vm3 = vcmp.eq.s32.totalorder %v1375_v45, %v3070_v6 }
  0xdd   : > { %2504 = vmatpush3.bf16.msra.mxu1 %v2503_v49  ;;  %2505 = vmatprep.subr.bf16.mxu0 %v2805_v8 }
  0xdf   : > { %1132 = vmatmul.mubr.f32.vlgmr.msra.gmra.mrb[24].mxu0 %v249_v50 }
  0xe0   : > { %1217 = vmatmul.mubr.f32.vlgmr.msra.gmra.mrb[24].mxu1 %v251_v51  ;;  %1136 = vmatprep.mubr.f32.mxu0 %v266_v52 }
  0xe1   : > { %1221 = vmatprep.mubr.f32.mxu1 %v268_v53  ;;  %2507 = vmatpush3.bf16.msk.msra.mxu0 %vm2506_vm2, %v2806_v10  ;;  %vm1498_vm2 = vcmp.eq.s32.totalorder %v1368_v41, %v3070_v6 }
  0xe2   : > { %2508 = vmatprep.subr.bf16.mxu0 %v2805_v8  ;;  %vm2524_vm7 = vmpackc.low %vm1499_vm3, %vm1498_vm2 }
  0xe3   : > { %1137 = vmatmul.mubr.f32.gmra.mrb[26].mxu0 %v265_v54 }
  0xe4   : > { %1222 = vmatmul.mubr.f32.gmra.mrb[26].mxu1 %v267_v55  ;;  %1141 = vmatprep.mubr.f32.mxu0 %v282_v56 }
  0xe5   : > { %1226 = vmatprep.mubr.f32.mxu1 %v284_v57  ;;  %2510 = vmatpush3.bf16.msk.msra.mxu0 %vm2509_vm5, %v2806_v10  ;;  %vm3119_vm5 = vcmp.eq.s32.totalorder %v1389_v47, %v3070_v6 }
  0xe6   : > { %2511 = vmatprep.subr.bf16.mxu0 %v2805_v8 }
  0xe7   : > { %1142 = vmatmul.mubr.f32.gmra.mrb[28].mxu0 %v281_v58 }
  0xe8   : > { %1227 = vmatmul.mubr.f32.gmra.mrb[28].mxu1 %v283_v59  ;;  %1146 = vmatprep.mubr.f32.mxu0 %v298_v60 }
  0xe9   : > { %1231 = vmatprep.mubr.f32.mxu1 %v300_v61  ;;  %2513 = vmatpush3.bf16.msk.msra.mxu0 %vm2512_vm8, %v2806_v10  ;;  %vm2527_vm8 = vmpackc.low %vm3119_vm5, %vm3114_vm4 }
  0xea   : > { %2514 = vmatprep.subr.bf16.mxu0 %v2805_v8 }
  0xeb   : > { %1147 = vmatmul.mubr.f32.gmra.mrb[30].mxu0 %v297_v62 }
  0xec   : > { %1232 = vmatmul.mubr.f32.gmra.mrb[30].mxu1 %v299_v63  ;;  %2246 = vmatprep.mubr.msk.f32.mxu0 %vm2808_vm6, %v2807_v25 }
  0xed   : > { %2516 = vmatpush3.bf16.msk.msra.mxu0 %vm2515_vm11, %v2806_v10 }
  0xee   : > { %2517 = vmatprep.subr.bf16.mxu0 %v2805_v8 }
  0xf1   : > { %2519 = vmatpush3.bf16.msk.msra.mxu0 %vm2518_vm14, %v2806_v10 }
  0xf2   : > { %2520 = vmatprep.subr.bf16.mxu0 %v2805_v8 }
  0xf5   : > { %2522 = vmatpush3.bf16.msk.msra.mxu0 %vm2521_vm1, %v2806_v10 }
  0xf6   : > { %2523 = vmatprep.subr.bf16.mxu0 %v2805_v8 }
  0xf9   : > { %2525 = vmatpush3.bf16.msk.msra.mxu0 %vm2524_vm7, %v2806_v10 }
  0xfa   : > { %2526 = vmatprep.subr.bf16.mxu0 %v2805_v8 }
  0xfd   : > { %2528 = vmatpush3.bf16.msk.msra.mxu0 %vm2527_vm8, %v2806_v10 }
 0x152   : > { %v1877_v28 = vpop.f32.mrb[0].mxu0 }
 0x153   : > { %v1921_v31 = vpop.f32.mrb[0].mxu1  ;;  %v1878_v32 = vpop.f32.mrb[1].mxu0 }
 0x154   : > { %v1879_v33 = vadd.f32 %v1878_v32, %v1877_v28  ;;  %v1922_v34 = vpop.f32.mrb[1].mxu1 }
 0x155   : > { %v1923_v36 = vadd.f32 %v1922_v34, %v1921_v31 }
 0x156   : > { %v1880_v40 = vpop.f32.mrb[2].mxu0 }
 0x157   : > { %v709_v42 = vadd.f32 %v1923_v36, %v1879_v33  ;;  %v1924_v43 = vpop.f32.mrb[2].mxu1  ;;  %v1881_v44 = vpop.f32.mrb[3].mxu0 }
 0x158   : > { %v1882_v48 = vadd.f32 %v1881_v44, %v1880_v40  ;;  %v1925_v49 = vpop.f32.mrb[3].mxu1 }
 0x159   : > { %v1926_v50 = vadd.f32 %v1925_v49, %v1924_v43 }
 0x15a   : > { %v1883_v53 = vpop.f32.mrb[4].mxu0 }
 0x15b   : > { %v714_v54 = vadd.f32 %v1926_v50, %v1882_v48  ;;  %v1927_v55 = vpop.f32.mrb[4].mxu1  ;;  %v1884_v56 = vpop.f32.mrb[5].mxu0 }
 0x15c   : > { %v1885_v57 = vadd.f32 %v1884_v56, %v1883_v53  ;;  %v1928_v58 = vpop.f32.mrb[5].mxu1 }
 0x15d   : > { %v1929_v59 = vadd.f32 %v1928_v58, %v1927_v55 }
 0x15e   : > { %v1886_v60 = vpop.f32.mrb[6].mxu0 }
 0x15f   : > { %v719_v61 = vadd.f32 %v1929_v59, %v1885_v57  ;;  %v1930_v62 = vpop.f32.mrb[6].mxu1  ;;  %v1887_v63 = vpop.f32.mrb[7].mxu0 }
 0x160   : > { %v1888_v0 = vadd.f32 %v1887_v63, %v1886_v60  ;;  %v1931_v2 = vpop.f32.mrb[7].mxu1 }
 0x161   : > { %v1932_v3 = vadd.f32 %v1931_v2, %v1930_v62 }
 0x163   : > { %v724_v4 = vadd.f32 %v1932_v3, %v1888_v0 }
 0x172   : > { %v1965_v5 = vpop.f32.mrb[8].mxu0 }
 0x173   : > { %v1966_v6 = vpop.f32.mrb[9].mxu0  ;;  %v2009_v7 = vpop.f32.mrb[8].mxu1 }
 0x174   : > { %v1967_v8 = vadd.f32 %v1966_v6, %v1965_v5  ;;  %v2010_v9 = vpop.f32.mrb[9].mxu1 }
 0x175   : > { %v2011_v11 = vadd.f32 %v2010_v9, %v2009_v7 }
 0x176   : > { %v794_v12 = vadd.f32 %v1967_v8, %v709_v42  ;;  %v1968_v13 = vpop.f32.mrb[10].mxu0 }
 0x177   : > { %v1969_v14 = vpop.f32.mrb[11].mxu0  ;;  %v2012_v15 = vpop.f32.mrb[10].mxu1 }
 0x178   : > { %v879_v16 = vadd.f32 %v2011_v11, %v794_v12  ;;  %v1970_v17 = vadd.f32 %v1969_v14, %v1968_v13  ;;  %v2013_v18 = vpop.f32.mrb[11].mxu1 }
 0x179   : > { %v2014_v19 = vadd.f32 %v2013_v18, %v2012_v15 }
 0x17a   : > { %v799_v20 = vadd.f32 %v1970_v17, %v714_v54  ;;  %v1971_v10 = vpop.f32.mrb[12].mxu0 }
 0x17b   : > { %v1972_v21 = vpop.f32.mrb[13].mxu0  ;;  %v2015_v22 = vpop.f32.mrb[12].mxu1 }
 0x17c   : > { %v884_v23 = vadd.f32 %v2014_v19, %v799_v20  ;;  %v1973_v24 = vadd.f32 %v1972_v21, %v1971_v10  ;;  %v2016_v25 = vpop.f32.mrb[13].mxu1 }
 0x17d   : > { %v2017_v26 = vadd.f32 %v2016_v25, %v2015_v22 }
 0x17e   : > { %v804_v27 = vadd.f32 %v1973_v24, %v719_v61  ;;  %v1974_v28 = vpop.f32.mrb[14].mxu0 }
 0x17f   : > { %v1975_v29 = vpop.f32.mrb[15].mxu0  ;;  %v2018_v30 = vpop.f32.mrb[14].mxu1 }
 0x180   : > { %v889_v31 = vadd.f32 %v2017_v26, %v804_v27  ;;  %v1976_v32 = vadd.f32 %v1975_v29, %v1974_v28  ;;  %v2019_v33 = vpop.f32.mrb[15].mxu1 }
 0x181   : > { %v2020_v34 = vadd.f32 %v2019_v33, %v2018_v30 }
 0x182   : > { %v809_v35 = vadd.f32 %v1976_v32, %v724_v4 }
 0x184   : > { %v894_v36 = vadd.f32 %v2020_v34, %v809_v35 }
 0x192   : > { %v2053_v37 = vpop.f32.mrb[16].mxu0 }
 0x193   : > { %v2054_v38 = vpop.f32.mrb[17].mxu0  ;;  %v2097_v39 = vpop.f32.mrb[16].mxu1 }
 0x194   : > { %v2055_v40 = vadd.f32 %v2054_v38, %v2053_v37  ;;  %v2098_v41 = vpop.f32.mrb[17].mxu1 }
 0x195   : > { %v2099_v42 = vadd.f32 %v2098_v41, %v2097_v39 }
 0x196   : > { %v964_v43 = vadd.f32 %v2055_v40, %v879_v16  ;;  %v2056_v44 = vpop.f32.mrb[18].mxu0 }
 0x197   : > { %v2057_v45 = vpop.f32.mrb[19].mxu0  ;;  %v2100_v46 = vpop.f32.mrb[18].mxu1 }
 0x198   : > { %v1049_v47 = vadd.f32 %v2099_v42, %v964_v43  ;;  %v2058_v48 = vadd.f32 %v2057_v45, %v2056_v44  ;;  %v2101_v49 = vpop.f32.mrb[19].mxu1 }
 0x199   : > { %v2102_v50 = vadd.f32 %v2101_v49, %v2100_v46 }
 0x19a   : > { %v969_v51 = vadd.f32 %v2058_v48, %v884_v23  ;;  %v2059_v52 = vpop.f32.mrb[20].mxu0 }
 0x19b   : > { %v2060_v53 = vpop.f32.mrb[21].mxu0  ;;  %v2103_v54 = vpop.f32.mrb[20].mxu1 }
 0x19c   : > { %v1054_v55 = vadd.f32 %v2102_v50, %v969_v51  ;;  %v2061_v56 = vadd.f32 %v2060_v53, %v2059_v52  ;;  %v2104_v57 = vpop.f32.mrb[21].mxu1  ;;  %v1243_v50 = vld [vmem:[#allocation2] sm:$0x1] }
 0x19d   : > { %v2105_v58 = vadd.f32 %v2104_v57, %v2103_v54 }
 0x19e   : > { %v974_v59 = vadd.f32 %v2061_v56, %v889_v31  ;;  %v2062_v60 = vpop.f32.mrb[22].mxu0 }
 0x19f   : > { %v2063_v61 = vpop.f32.mrb[23].mxu0  ;;  %v2106_v62 = vpop.f32.mrb[22].mxu1 }
 0x1a0   : > { %v1059_v63 = vadd.f32 %v2105_v58, %v974_v59  ;;  %v2064_v0 = vadd.f32 %v2063_v61, %v2062_v60  ;;  %v2107_v2 = vpop.f32.mrb[23].mxu1 }
 0x1a1   : > { %v2108_v3 = vadd.f32 %v2107_v2, %v2106_v62 }
 0x1a2   : > { %v979_v4 = vadd.f32 %v2064_v0, %v894_v36 }
 0x1a4   : > { %v1064_v5 = vadd.f32 %v2108_v3, %v979_v4  ;;  %v1627_v3 = vsub.s32 0, %v3066_v1 }
 0x1b2   : > { %v2141_v6 = vpop.f32.mrb[24].mxu0 }
 0x1b3   : > { %v2142_v7 = vpop.f32.mrb[25].mxu0  ;;  %v2185_v8 = vpop.f32.mrb[24].mxu1 }
 0x1b4   : > { %v2143_v9 = vadd.f32 %v2142_v7, %v2141_v6  ;;  %v2186_v11 = vpop.f32.mrb[25].mxu1 }
 0x1b5   : > { %v2187_v12 = vadd.f32 %v2186_v11, %v2185_v8 }
 0x1b6   : > { %v1134_v13 = vadd.f32 %v2143_v9, %v1049_v47  ;;  %v2144_v14 = vpop.f32.mrb[26].mxu0 }
 0x1b7   : > { %v2145_v15 = vpop.f32.mrb[27].mxu0  ;;  %v2188_v16 = vpop.f32.mrb[26].mxu1 }
 0x1b8   : > { %v3130_v17 = vadd.f32 %v2187_v12, %v1134_v13  ;;  %v2146_v18 = vadd.f32 %v2145_v15, %v2144_v14  ;;  %v2189_v19 = vpop.f32.mrb[27].mxu1 }
 0x1b9   : > { %v2190_v20 = vadd.f32 %v2189_v19, %v2188_v16 }
 0x1ba   : > { %v1139_v10 = vadd.f32 %v2146_v18, %v1054_v55  ;;  %v2147_v21 = vpop.f32.mrb[28].mxu0  ;;  %v1244_v37 = vmul.f32 %v3130_v17, %v3130_v17 }
 0x1bb   : > { %v2148_v22 = vpop.f32.mrb[29].mxu0  ;;  %v2191_v23 = vpop.f32.mrb[28].mxu1 }
 0x1bc   : > { %v3132_v24 = vadd.f32 %v2190_v20, %v1139_v10  ;;  %v2149_v25 = vadd.f32 %v2148_v22, %v2147_v21  ;;  %v2192_v26 = vpop.f32.mrb[29].mxu1 }
 0x1bd   : > { %v2193_v27 = vadd.f32 %v2192_v26, %v2191_v23 }
 0x1be   : > { %v1144_v28 = vadd.f32 %v2149_v25, %v1059_v63  ;;  %v2150_v29 = vpop.f32.mrb[30].mxu0  ;;  %v1245_v32 = vmul.f32 %v3132_v24, %v3132_v24 }
 0x1bf   : > { %v2151_v30 = vpop.f32.mrb[31].mxu0  ;;  %v2194_v31 = vpop.f32.mrb[30].mxu1 }
 0x1c0   : > { %v3136_v33 = vadd.f32 %v2193_v27, %v1144_v28  ;;  %v2152_v34 = vadd.f32 %v2151_v30, %v2150_v29  ;;  %v2195_v35 = vpop.f32.mrb[31].mxu1  ;;  %v1248_v40 = vadd.f32 %v1245_v32, %v1244_v37 }
 0x1c1   : > { %v2196_v36 = vadd.f32 %v2195_v35, %v2194_v31 }
 0x1c2   : > { %v1246_v38 = vmul.f32 %v3136_v33, %v3136_v33  ;;  %v1149_v39 = vadd.f32 %v2152_v34, %v1064_v5 }
 0x1c4   : > { %v3142_v41 = vadd.f32 %v2196_v36, %v1149_v39  ;;  %v1249_v42 = vadd.f32 %v1248_v40, %v1246_v38 }
 0x1c6   : > { %v1247_v43 = vmul.f32 %v3142_v41, %v3142_v41 }
 0x1c8   : > { %v1250_v44 = vadd.f32 %v1249_v42, %v1247_v43 }
 0x1ca   : > { %v1251_v45 = vrot.slane %v1250_v44, 4 }
 0x1cc   : > { %v1252_v46 = vadd.f32 %v1251_v45, %v1250_v44 }
 0x1ce   : > { %v1253_v47 = vrot.slane %v1252_v46, 2 }
 0x1d0   : > { %v1254_v48 = vadd.f32 %v1253_v47, %v1252_v46 }
 0x1d2   : > { %v1255_v49 = vrot.slane %v1254_v48, 1 }
 0x1d4   : > { %v1256_v51 = vadd.f32 %v1255_v49, %v1254_v48 }
 0x1d6   : > { %v1257_v52 = vadd.f32 %v1256_v51, %v1243_v50 }
 0x1d8   : > { %1258 = vst [vmem:[#allocation2] sm:$0x1] %v1257_v52 }
 0x1df   : > { %v1262_v53 = vld [vmem:[#allocation2] sm:$0x1] }
 0x1e0   : > { %2247 = vmatmul.mubr.f32.vlgmr.msra.gmra.mrb[32].mxu0 %v1262_v53 }
 0x2b3   : > { %v1600_v54 = vpop.f32.mrb[32].mxu0 }
 0x2b4   : > { %2616 = vrsqrt.f32 %v1600_v54  ;;  %v2248_v55 = vpop.f32.mrb[33].mxu0  ;;  %vm1606_vm9 = vcmp.eq.f32.partialorder %v1600_v54, inf  ;;  %v1609_v58 = vand.u32 2147483648, %v1600_v54  ;;  %vm1608_vm10 = vcmp.eq.f32.partialorder %v1600_v54, 0.0 }
 0x2be   : > { %v2617_v56 = vpop.eup %2616 }
 0x2bf   : > { %v1605_v57 = vmul.f32 %v2617_v56, %v1600_v54 }
 0x2c1   : > { %v1607_v59 = vsel %vm1606_vm9, %v1600_v54, %v1605_v57 }
 0x2c2   : > { %v1610_v60 = vsel %vm1608_vm10, %v1609_v58, %v1607_v59 }
 0x2c3   : > { %2618 = vrsqrt.f32 %v1610_v60  ;;  %v1618_v61 = vadd.f32 1e-08, %v1610_v60  ;;  %vm1613_vm11 = vcmp.eq.f32.partialorder %v1610_v60, inf  ;;  %v1616_v0 = vand.u32 2147483648, %v1610_v60 }
 0x2c4   : > { %vm1615_vm12 = vcmp.eq.f32.partialorder %v1610_v60, 0.0 }
 0x2c5   : > { %2620 = vrcp.f32 %v1618_v61 }
 0x2cd   : > { %v2619_v62 = vpop.eup %2618 }
 0x2ce   : > { %v1612_v63 = vmul.f32 %v2619_v62, %v1610_v60 }
 0x2cf   : > { %v2621_v4 = vpop.eup %2620 }
 0x2d0   : > { %v1614_v2 = vsel %vm1613_vm11, %v1610_v60, %v1612_v63 }
 0x2d1   : > { %v1617_v5 = vsel %vm1615_vm12, %v1616_v0, %v1614_v2 }
 0x2d2   : > { %v1620_v6 = vmul.f32 %v2621_v4, %v1617_v5  ;;  %1637 = vst [vmem:[%s230_s24] sm:$0x1] %v1617_v5 }
 0x2d3   : > { %2693 = shalt.err (!%p2690_p5)
}
 0x2d4   : > { %s2694_s7 = scalar_lea.hbm %s3153_s18, 16  ;;  %s2698_s24 = scalar_lea.hbm %s3252_s3, 32 }
 0x2d5   : > { %p2695_p9 = scmp.ne.s32.totalorder %s3153_s18, %s2694_s7  ;;  %p2699_p3 = scmp.lt.u32.totalorder %s3153_s18, %s3252_s3 }
 0x2d6   : > { %p2700_p7 = scmp.lt.u32.totalorder %s2698_s24, %s2694_s7  ;;  %p2702_p4 = scmp.lt.u32.totalorder %s2694_s7, %s3153_s18 }
 0x2d7   : > { %p2696_p1 = pnand %p2695_p9, %p2931_p10 }
 0x2d8   : > { %p2701_p13 = por %p2700_p7, %p2699_p3 }
 0x2d9   : > { %p2697_p2 = pneg %p2696_p1 }
 0x2da   : > { %p2703_p6 = por %p2702_p4, %p2701_p13 }
 0x2dc   : > { %p2704_p8 = pnand %p2703_p6, %p2697_p2 }
 0x2de   : > { %2707 = shalt.err (!%p2704_p8)
}
 0x2df   : > { %2536 = dma.vmem_to_hbm [thread:$0]  (%p2931_p10), %s3155_s10, 16, %s3153_s18, %s1644_s21   ;;  %v1628_v1 = vrot.slane %v1620_v6, %v1627_v3 }
 0x2e0   : > { %s3188_s29 = scalar_lea.hbm %s3251_s2, %s1844_s19  ;;  %s1639_s15 = scalar_lea.sflag [#allocation5], %s2988_s4 }
 0x2e1   : > { %v1629_v7 = vmul.f32 %v1628_v1, %v3130_v17  ;;  %v1630_v8 = vmul.f32 %v1628_v1, %v3132_v24  ;;  %v1631_v9 = vmul.f32 %v1628_v1, %v3136_v33  ;;  %v1632_v11 = vmul.f32 %v1628_v1, %v3142_v41  ;;  %s2708_s10 = scalar_lea.vmem %s3192_s8, 512  ;;  %s2810_s18 = smov [#allocation8]  }
 0x2e2   : > { %p2709_p12 = scmp.ne.s32.totalorder %s3192_s8, %s2708_s10  ;;  %s2712_s19 = sshll.u32 %s2810_s18, 4  ;;  %s2713_s19 = int_to_ptr.vmem [resolvable:$false] %s2712_s19 }
 0x2e3   : > { %1633 = vst [vmem:[%s3158_s26] sm:$0xff] %v1629_v7  ;;  %1634 = vst [vmem:[%s3158_s26 + $0x8] sm:$0xff] %v1630_v8  ;;  %s2714_s21 = scalar_lea.vmem %s2713_s19, 1024  ;;  %p2715_p5 = scmp.lt.s32.totalorder %s3192_s8, %s2713_s19 }
 0x2e4   : > { %1635 = vst [vmem:[%s3158_s26 + $0x10] sm:$0xff] %v1631_v9  ;;  %1636 = vst [vmem:[%s3158_s26 + $0x18] sm:$0xff] %v1632_v11  ;;  %p2710_p11 = pnand %p2709_p12, %p2931_p10  ;;  %p2716_p9 = scmp.lt.s32.totalorder %s2714_s21, %s2708_s10 }
 0x2e6   : > { %p2711_p0 = pneg %p2710_p11  ;;  %p2717_p1 = por %p2716_p9, %p2715_p5 }
 0x2e8   : > { %p2718_p2 = pnand %p2717_p1, %p2711_p0 }
 0x2ea   : > { %2721 = shalt.err (!%p2718_p2)
}
 0x2eb   : > { %s2722_s26 = scalar_lea.hbm %s3188_s29, 512  ;;  %s2726_s20 = scalar_lea.hbm %s3251_s2, 1024 }
 0x2ec   : > { %p2723_p3 = scmp.ne.s32.totalorder %s3188_s29, %s2722_s26  ;;  %p2727_p4 = scmp.lt.u32.totalorder %s3188_s29, %s3251_s2 }
 0x2ed   : > { %p2728_p6 = scmp.lt.u32.totalorder %s2726_s20, %s2722_s26  ;;  %p2730_p12 = scmp.lt.u32.totalorder %s2722_s26, %s3188_s29 }
 0x2ee   : > { %p2724_p7 = pnand %p2723_p3, %p2931_p10 }
 0x2ef   : > { %p2729_p8 = por %p2728_p6, %p2727_p4 }
 0x2f0   : > { %p2725_p13 = pneg %p2724_p7 }
 0x2f1   : > { %p2731_p11 = por %p2730_p12, %p2729_p8 }
 0x2f3   : > { %p2732_p0 = pnand %p2731_p11, %p2725_p13 }
 0x2f5   : > { %2735 = shalt.err (!%p2732_p0)
}
 0x2f6   : > { %s2811_s9 = smov 128   ;;  %s2812_s11 = smov 8  }
 0x2f7   : > { %2535 = dma.vmem_to_hbm [thread:$0]  (%p2931_p10), %s3192_s8, 512, %s3188_s29, %s1639_s15, %s2811_s9, %s2811_s9, %s2812_s11  }
 0x2f8 PF: > { %s1684_s30 = sand.u32 1, %s2778_s12   ;;  %p3274_p5 = scmp.ne.s32.totalorder %s3260_s23, 0 }
 0x2f9   : > { %p3275_p9 = scmp.ge.s32.totalorder %s2798_s17, 2  ;;  %s1685_s25 = scalar_lea.sflag [#allocation5], %s1684_s30 }
 0x2fb   : > { %p2548_p1 = pnand %p3275_p9, %p3274_p5 }
 0x2fd   : > { %2769 = dma.done.wait (!%p2548_p1), %s1685_s25, 512  }
 0x2fe   : > { %2771 = vsyncadd (!%p2548_p1), %s1685_s25, 4294966784  ;;  %s1694_s10 = scalar_lea.sflag [#allocation10], %s1684_s30 }
 0x2ff   : > { %2773 = dma.done.wait (!%p2548_p1), %s1694_s10, 16  }
 0x300   : > { %2775 = vsyncadd (!%p2548_p1), %s1694_s10, 4294967280  ;;  %s24_s17 = sadd.s32 1, %s2798_s17   ;;  %s3276_s12 = smov %s2782_s13 }
 0x301   : > { %p21_p2 = scmp.ge.s32.totalorder %s24_s17, 4   ;;  %s3277_s13 = smov %s2786_s14 }
 0x302   : > { %s3278_s14 = smov %s2940_s5  ;;  %s3279_s15 = smov %s2794_s16 }
 0x303   : > { %s3280_s16 = smov %s3282_s28  ;;  %23 = sbr.rel (!%p21_p2) target bundleno = 9 (0x9), region = 103 }
 0x30a   :  { %1698 = vsyncpa [#allocation4], 1 }
 0x30b   :  { %1700 = vsyncpa [#allocation4 + $0x1], 1 }
 0x30c   :  { %1701 = vsyncpa [#allocation7], 1 }
 0x30d   :  { %1702 = vsyncpa [#allocation5], 1 }
 0x30e   :  { %1704 = vsyncpa [#allocation5 + $0x1], 1 }
 0x30f   :  { %1705 = vsyncpa [#allocation10], 1 }
 0x310   :  { %1707 = vsyncpa [#allocation10 + $0x1], 1 }

</bundles_post_ra>
